<compile_context>
chip_gen: v6e
topology: v6e:2x2x1
jax: 0.10.0
libtpu: 0.0.40
codegen_flags: <defaults>
</compile_context>

<pallas_src>
import jax
import jax.numpy as jnp
from jax.experimental import pallas as pl
from jax.experimental.pallas import tpu as pltpu

ITERATIONS = 24
CHUNK = 6
IN_FEATURES = ITERATIONS * CHUNK      # 144
HIDDEN = (128, 256, 64)
OUT_FEATURES = 3
OUT_PAD = 8                           # lane-padded output width (extra cols are zero)


def _round_up(n, m):
    return (n + m - 1) // m * m


def _fused_mlp_kernel(*refs):
    x_refs = refs[:ITERATIONS]
    w1c, b1, w2, b2, w3, b3, w4, b4 = refs[ITERATIONS:ITERATIONS + 8]
    o_ref = refs[ITERATIONS + 8]

    # ---- Layer 1: torch.cat fused into the GEMM ----------------------------
    #   cat(x_i) @ W1 + b1  ==  b1 + sum_i x_i @ W1[6i:6i+6, :]
    h = jnp.dot(x_refs[0][...].astype(jnp.bfloat16), w1c[0],
                preferred_element_type=jnp.float32) + b1[...]
    for i in range(1, ITERATIONS):
        h = h + jnp.dot(x_refs[i][...].astype(jnp.bfloat16), w1c[i],
                        preferred_element_type=jnp.float32)
    h = jnp.maximum(h, 0.0).astype(jnp.bfloat16)

    # ---- Layer 2 ------------------------------------------------------------
    h = jnp.dot(h, w2[...], preferred_element_type=jnp.float32) + b2[...]
    h = jnp.maximum(h, 0.0).astype(jnp.bfloat16)

    # ---- Layer 3 ------------------------------------------------------------
    h = jnp.dot(h, w3[...], preferred_element_type=jnp.float32) + b3[...]
    h = jnp.maximum(h, 0.0).astype(jnp.bfloat16)

    # ---- Layer 4 (no ReLU) ---------------------------------------------------
    out = jnp.dot(h, w4[...], preferred_element_type=jnp.float32) + b4[...]
    o_ref[...] = out.astype(o_ref.dtype)


def target_model_forward(x_list, params, block_b=512):
    """Mirrors TargetModel.forward: x_list is a list of 24 (B, 6) f32 tensors."""
    assert len(x_list) == ITERATIONS
    B = x_list[0].shape[0]

    block_b = _round_up(block_b, 8)
    TB = min(block_b, _round_up(B, 8))        # rows per grid step (multiple of 8)
    B_pad = _round_up(B, TB)
    if B_pad != B:
        pad = B_pad - B
        x_list = [jnp.pad(x, ((0, pad), (0, 0))) for x in x_list]

    w1, b1, w2, b2, w3, b3, w4, b4 = (
        params["w1"], params["b1"], params["w2"], params["b2"],
        params["w3"], params["b3"], params["w4"], params["b4"],
    )
    # Pre-split W1 into per-list-element chunks: (144,128) -> (24, 6, 128).
    # Pure reshape at trace time (row 6i+j of W1 multiplies x_i[:, j]).
    w1c = w1.reshape(ITERATIONS, CHUNK, HIDDEN[0])

    x_spec = pl.BlockSpec((TB, CHUNK), lambda i: (i, 0))
    # Weights/biases: whole-array blocks with constant index_map -> DMA'd once,
    # VMEM-resident across all batch tiles.
    resident = lambda a: pl.BlockSpec(a.shape, lambda i: (0,) * a.ndim)

    out = pl.pallas_call(
        _fused_mlp_kernel,
        out_shape=jax.ShapeDtypeStruct((B_pad, OUT_PAD), jnp.float32),
        grid=(B_pad // TB,),
        in_specs=[x_spec] * ITERATIONS + [
            resident(w1c), resident(b1), resident(w2), resident(b2),
            resident(w3), resident(b3), resident(w4), resident(b4),
        ],
        out_specs=pl.BlockSpec((TB, OUT_PAD), lambda i: (i, 0)),
        compiler_params=pltpu.CompilerParams(
            dimension_semantics=("parallel",)),
    )(*x_list, w1c, b1, w2, b2, w3, b3, w4, b4)

    return out[:B, :OUT_FEATURES]


def init_params(key):
    """nn.Linear-style init (uniform +-1/sqrt(fan_in)); weights stored (fan_in, fan_out)."""
    dims = [IN_FEATURES, *HIDDEN, OUT_FEATURES]   # [144, 128, 256, 64, 3]
    params = {}
    for i in range(4):
        fan_in, fan_out = dims[i], dims[i + 1]
        key, kw, kb = jax.random.split(key, 3)
        bound = 1.0 / float(fan_in) ** 0.5
        w = jax.random.uniform(kw, (fan_in, fan_out), jnp.float32, -bound, bound)
        b = jax.random.uniform(kb, (1, fan_out), jnp.float32, -bound, bound)
        if fan_out == OUT_FEATURES:
            # Zero-pad the last layer to a lane-denser output width; the extra
            # columns are exactly zero and are sliced off in the wrapper.
            w = jnp.pad(w, ((0, 0), (0, OUT_PAD - OUT_FEATURES)))
            b = jnp.pad(b, ((0, 0), (0, OUT_PAD - OUT_FEATURES)))
        params[f"w{i + 1}"] = w.astype(jnp.bfloat16)   # bf16 MXU operands
        params[f"b{i + 1}"] = b                        # f32 bias / accumulation
    return params


def reference_forward(x_list, params):
    """Plain-JAX reference with the same bf16-operand / f32-accumulate recipe."""
    h = jnp.concatenate(x_list, axis=1)
    for i in range(1, 5):
        w, b = params[f"w{i}"], params[f"b{i}"]
        h = jnp.dot(h.astype(jnp.bfloat16), w,
                    preferred_element_type=jnp.float32) + b
        if i < 4:
            h = jnp.maximum(h, 0.0)
    return h[:, :OUT_FEATURES]


if __name__ == "__main__":
    key = jax.random.PRNGKey(0)
    pkey, xkey = jax.random.split(key)

    params = init_params(pkey)

    B = 8
    xkeys = jax.random.split(xkey, ITERATIONS)
    x_list = [jax.random.normal(k, (B, CHUNK), jnp.float32) for k in xkeys]

    out = target_model_forward(x_list, params)
    out = jax.block_until_ready(out)

    ref = reference_forward(x_list, params)
    assert out.shape == (B, OUT_FEATURES)
    assert bool(jnp.allclose(out, ref, atol=1e-2, rtol=1e-2)), (
        f"max abs err {float(jnp.max(jnp.abs(out - ref)))}")

    print("KERNEL_OK")
</pallas_src>

<mosaic_0001>
module attributes {stable_mosaic.version = 11 : i64} {
  func.func @_fused_mlp_kernel(%arg0: i32, %arg1: memref<8x6xf32, #tpu.memory_space<vmem>>, %arg2: memref<8x6xf32, #tpu.memory_space<vmem>>, %arg3: memref<8x6xf32, #tpu.memory_space<vmem>>, %arg4: memref<8x6xf32, #tpu.memory_space<vmem>>, %arg5: memref<8x6xf32, #tpu.memory_space<vmem>>, %arg6: memref<8x6xf32, #tpu.memory_space<vmem>>, %arg7: memref<8x6xf32, #tpu.memory_space<vmem>>, %arg8: memref<8x6xf32, #tpu.memory_space<vmem>>, %arg9: memref<8x6xf32, #tpu.memory_space<vmem>>, %arg10: memref<8x6xf32, #tpu.memory_space<vmem>>, %arg11: memref<8x6xf32, #tpu.memory_space<vmem>>, %arg12: memref<8x6xf32, #tpu.memory_space<vmem>>, %arg13: memref<8x6xf32, #tpu.memory_space<vmem>>, %arg14: memref<8x6xf32, #tpu.memory_space<vmem>>, %arg15: memref<8x6xf32, #tpu.memory_space<vmem>>, %arg16: memref<8x6xf32, #tpu.memory_space<vmem>>, %arg17: memref<8x6xf32, #tpu.memory_space<vmem>>, %arg18: memref<8x6xf32, #tpu.memory_space<vmem>>, %arg19: memref<8x6xf32, #tpu.memory_space<vmem>>, %arg20: memref<8x6xf32, #tpu.memory_space<vmem>>, %arg21: memref<8x6xf32, #tpu.memory_space<vmem>>, %arg22: memref<8x6xf32, #tpu.memory_space<vmem>>, %arg23: memref<8x6xf32, #tpu.memory_space<vmem>>, %arg24: memref<8x6xf32, #tpu.memory_space<vmem>>, %arg25: memref<24x6x128xbf16, #tpu.memory_space<vmem>>, %arg26: memref<1x128xf32, #tpu.memory_space<vmem>>, %arg27: memref<128x256xbf16, #tpu.memory_space<vmem>>, %arg28: memref<1x256xf32, #tpu.memory_space<vmem>>, %arg29: memref<256x64xbf16, #tpu.memory_space<vmem>>, %arg30: memref<1x64xf32, #tpu.memory_space<vmem>>, %arg31: memref<64x8xbf16, #tpu.memory_space<vmem>>, %arg32: memref<1x8xf32, #tpu.memory_space<vmem>>, %arg33: memref<8x8xf32, #tpu.memory_space<vmem>>) attributes {dimension_semantics = [#tpu.dimension_semantics<parallel>], iteration_bounds = array<i64: 1>, scalar_prefetch = 0 : i64, scratch_operands = 0 : i64, tpu.core_type = #tpu.core_type<tc>, window_params = [{transform_indices = @transform_0, window_bounds = array<i64: 8, 6>}, {transform_indices = @transform_1, window_bounds = array<i64: 8, 6>}, {transform_indices = @transform_2, window_bounds = array<i64: 8, 6>}, {transform_indices = @transform_3, window_bounds = array<i64: 8, 6>}, {transform_indices = @transform_4, window_bounds = array<i64: 8, 6>}, {transform_indices = @transform_5, window_bounds = array<i64: 8, 6>}, {transform_indices = @transform_6, window_bounds = array<i64: 8, 6>}, {transform_indices = @transform_7, window_bounds = array<i64: 8, 6>}, {transform_indices = @transform_8, window_bounds = array<i64: 8, 6>}, {transform_indices = @transform_9, window_bounds = array<i64: 8, 6>}, {transform_indices = @transform_10, window_bounds = array<i64: 8, 6>}, {transform_indices = @transform_11, window_bounds = array<i64: 8, 6>}, {transform_indices = @transform_12, window_bounds = array<i64: 8, 6>}, {transform_indices = @transform_13, window_bounds = array<i64: 8, 6>}, {transform_indices = @transform_14, window_bounds = array<i64: 8, 6>}, {transform_indices = @transform_15, window_bounds = array<i64: 8, 6>}, {transform_indices = @transform_16, window_bounds = array<i64: 8, 6>}, {transform_indices = @transform_17, window_bounds = array<i64: 8, 6>}, {transform_indices = @transform_18, window_bounds = array<i64: 8, 6>}, {transform_indices = @transform_19, window_bounds = array<i64: 8, 6>}, {transform_indices = @transform_20, window_bounds = array<i64: 8, 6>}, {transform_indices = @transform_21, window_bounds = array<i64: 8, 6>}, {transform_indices = @transform_22, window_bounds = array<i64: 8, 6>}, {transform_indices = @transform_23, window_bounds = array<i64: 8, 6>}, {pipeline_mode = #tpu.pipeline_mode<synchronous>, transform_indices = @transform_24, window_bounds = array<i64: 24, 6, 128>}, {pipeline_mode = #tpu.pipeline_mode<synchronous>, transform_indices = @transform_25, window_bounds = array<i64: 1, 128>}, {pipeline_mode = #tpu.pipeline_mode<synchronous>, transform_indices = @transform_26, window_bounds = array<i64: 128, 256>}, {pipeline_mode = #tpu.pipeline_mode<synchronous>, transform_indices = @transform_27, window_bounds = array<i64: 1, 256>}, {pipeline_mode = #tpu.pipeline_mode<synchronous>, transform_indices = @transform_28, window_bounds = array<i64: 256, 64>}, {pipeline_mode = #tpu.pipeline_mode<synchronous>, transform_indices = @transform_29, window_bounds = array<i64: 1, 64>}, {pipeline_mode = #tpu.pipeline_mode<synchronous>, transform_indices = @transform_30, window_bounds = array<i64: 64, 8>}, {pipeline_mode = #tpu.pipeline_mode<synchronous>, transform_indices = @transform_31, window_bounds = array<i64: 1, 8>}, {transform_indices = @transform_32, window_bounds = array<i64: 8, 8>}]} {
    %c0 = arith.constant 0 : index
    %c0_0 = arith.constant 0 : index
    %0 = vector.load %arg1[%c0, %c0_0] : memref<8x6xf32, #tpu.memory_space<vmem>>, vector<8x6xf32>
    %1 = arith.truncf %0 : vector<8x6xf32> to vector<8x6xbf16>
    %c0_1 = arith.constant 0 : index
    %c0_2 = arith.constant 0 : index
    %c0_3 = arith.constant 0 : index
    %2 = vector.load %arg25[%c0_1, %c0_2, %c0_3] : memref<24x6x128xbf16, #tpu.memory_space<vmem>>, vector<1x6x128xbf16>
    %3 = vector.shape_cast %2 : vector<1x6x128xbf16> to vector<6x128xbf16>
    %cst = arith.constant dense<0.000000e+00> : vector<8x128xf32>
    %4 = tpu.matmul %1, %3, %cst {dimension_numbers = #tpu.dot_dimension_numbers<[1], [0], [0], [1], [0, 0, 1, 1], [], []>} : vector<8x6xbf16>, vector<6x128xbf16>, vector<8x128xf32> -> vector<8x128xf32>
    %c0_4 = arith.constant 0 : index
    %c0_5 = arith.constant 0 : index
    %5 = vector.load %arg26[%c0_4, %c0_5] : memref<1x128xf32, #tpu.memory_space<vmem>>, vector<1x128xf32>
    %6 = vector.broadcast %5 : vector<1x128xf32> to vector<8x128xf32>
    %7 = arith.addf %4, %6 : vector<8x128xf32>
    %c0_6 = arith.constant 0 : index
    %c0_7 = arith.constant 0 : index
    %8 = vector.load %arg2[%c0_6, %c0_7] : memref<8x6xf32, #tpu.memory_space<vmem>>, vector<8x6xf32>
    %9 = arith.truncf %8 : vector<8x6xf32> to vector<8x6xbf16>
    %c1 = arith.constant 1 : index
    %c0_8 = arith.constant 0 : index
    %c0_9 = arith.constant 0 : index
    %10 = vector.load %arg25[%c1, %c0_8, %c0_9] : memref<24x6x128xbf16, #tpu.memory_space<vmem>>, vector<1x6x128xbf16>
    %11 = vector.shape_cast %10 : vector<1x6x128xbf16> to vector<6x128xbf16>
    %cst_10 = arith.constant dense<0.000000e+00> : vector<8x128xf32>
    %12 = tpu.matmul %9, %11, %cst_10 {dimension_numbers = #tpu.dot_dimension_numbers<[1], [0], [0], [1], [0, 0, 1, 1], [], []>} : vector<8x6xbf16>, vector<6x128xbf16>, vector<8x128xf32> -> vector<8x128xf32>
    %13 = arith.addf %7, %12 : vector<8x128xf32>
    %c0_11 = arith.constant 0 : index
    %c0_12 = arith.constant 0 : index
    %14 = vector.load %arg3[%c0_11, %c0_12] : memref<8x6xf32, #tpu.memory_space<vmem>>, vector<8x6xf32>
    %15 = arith.truncf %14 : vector<8x6xf32> to vector<8x6xbf16>
    %c2 = arith.constant 2 : index
    %c0_13 = arith.constant 0 : index
    %c0_14 = arith.constant 0 : index
    %16 = vector.load %arg25[%c2, %c0_13, %c0_14] : memref<24x6x128xbf16, #tpu.memory_space<vmem>>, vector<1x6x128xbf16>
    %17 = vector.shape_cast %16 : vector<1x6x128xbf16> to vector<6x128xbf16>
    %cst_15 = arith.constant dense<0.000000e+00> : vector<8x128xf32>
    %18 = tpu.matmul %15, %17, %cst_15 {dimension_numbers = #tpu.dot_dimension_numbers<[1], [0], [0], [1], [0, 0, 1, 1], [], []>} : vector<8x6xbf16>, vector<6x128xbf16>, vector<8x128xf32> -> vector<8x128xf32>
    %19 = arith.addf %13, %18 : vector<8x128xf32>
    %c0_16 = arith.constant 0 : index
    %c0_17 = arith.constant 0 : index
    %20 = vector.load %arg4[%c0_16, %c0_17] : memref<8x6xf32, #tpu.memory_space<vmem>>, vector<8x6xf32>
    %21 = arith.truncf %20 : vector<8x6xf32> to vector<8x6xbf16>
    %c3 = arith.constant 3 : index
    %c0_18 = arith.constant 0 : index
    %c0_19 = arith.constant 0 : index
    %22 = vector.load %arg25[%c3, %c0_18, %c0_19] : memref<24x6x128xbf16, #tpu.memory_space<vmem>>, vector<1x6x128xbf16>
    %23 = vector.shape_cast %22 : vector<1x6x128xbf16> to vector<6x128xbf16>
    %cst_20 = arith.constant dense<0.000000e+00> : vector<8x128xf32>
    %24 = tpu.matmul %21, %23, %cst_20 {dimension_numbers = #tpu.dot_dimension_numbers<[1], [0], [0], [1], [0, 0, 1, 1], [], []>} : vector<8x6xbf16>, vector<6x128xbf16>, vector<8x128xf32> -> vector<8x128xf32>
    %25 = arith.addf %19, %24 : vector<8x128xf32>
    %c0_21 = arith.constant 0 : index
    %c0_22 = arith.constant 0 : index
    %26 = vector.load %arg5[%c0_21, %c0_22] : memref<8x6xf32, #tpu.memory_space<vmem>>, vector<8x6xf32>
    %27 = arith.truncf %26 : vector<8x6xf32> to vector<8x6xbf16>
    %c4 = arith.constant 4 : index
    %c0_23 = arith.constant 0 : index
    %c0_24 = arith.constant 0 : index
    %28 = vector.load %arg25[%c4, %c0_23, %c0_24] : memref<24x6x128xbf16, #tpu.memory_space<vmem>>, vector<1x6x128xbf16>
    %29 = vector.shape_cast %28 : vector<1x6x128xbf16> to vector<6x128xbf16>
    %cst_25 = arith.constant dense<0.000000e+00> : vector<8x128xf32>
    %30 = tpu.matmul %27, %29, %cst_25 {dimension_numbers = #tpu.dot_dimension_numbers<[1], [0], [0], [1], [0, 0, 1, 1], [], []>} : vector<8x6xbf16>, vector<6x128xbf16>, vector<8x128xf32> -> vector<8x128xf32>
    %31 = arith.addf %25, %30 : vector<8x128xf32>
    %c0_26 = arith.constant 0 : index
    %c0_27 = arith.constant 0 : index
    %32 = vector.load %arg6[%c0_26, %c0_27] : memref<8x6xf32, #tpu.memory_space<vmem>>, vector<8x6xf32>
    %33 = arith.truncf %32 : vector<8x6xf32> to vector<8x6xbf16>
    %c5 = arith.constant 5 : index
    %c0_28 = arith.constant 0 : index
    %c0_29 = arith.constant 0 : index
    %34 = vector.load %arg25[%c5, %c0_28, %c0_29] : memref<24x6x128xbf16, #tpu.memory_space<vmem>>, vector<1x6x128xbf16>
    %35 = vector.shape_cast %34 : vector<1x6x128xbf16> to vector<6x128xbf16>
    %cst_30 = arith.constant dense<0.000000e+00> : vector<8x128xf32>
    %36 = tpu.matmul %33, %35, %cst_30 {dimension_numbers = #tpu.dot_dimension_numbers<[1], [0], [0], [1], [0, 0, 1, 1], [], []>} : vector<8x6xbf16>, vector<6x128xbf16>, vector<8x128xf32> -> vector<8x128xf32>
    %37 = arith.addf %31, %36 : vector<8x128xf32>
    %c0_31 = arith.constant 0 : index
    %c0_32 = arith.constant 0 : index
    %38 = vector.load %arg7[%c0_31, %c0_32] : memref<8x6xf32, #tpu.memory_space<vmem>>, vector<8x6xf32>
    %39 = arith.truncf %38 : vector<8x6xf32> to vector<8x6xbf16>
    %c6 = arith.constant 6 : index
    %c0_33 = arith.constant 0 : index
    %c0_34 = arith.constant 0 : index
    %40 = vector.load %arg25[%c6, %c0_33, %c0_34] : memref<24x6x128xbf16, #tpu.memory_space<vmem>>, vector<1x6x128xbf16>
    %41 = vector.shape_cast %40 : vector<1x6x128xbf16> to vector<6x128xbf16>
    %cst_35 = arith.constant dense<0.000000e+00> : vector<8x128xf32>
    %42 = tpu.matmul %39, %41, %cst_35 {dimension_numbers = #tpu.dot_dimension_numbers<[1], [0], [0], [1], [0, 0, 1, 1], [], []>} : vector<8x6xbf16>, vector<6x128xbf16>, vector<8x128xf32> -> vector<8x128xf32>
    %43 = arith.addf %37, %42 : vector<8x128xf32>
    %c0_36 = arith.constant 0 : index
    %c0_37 = arith.constant 0 : index
    %44 = vector.load %arg8[%c0_36, %c0_37] : memref<8x6xf32, #tpu.memory_space<vmem>>, vector<8x6xf32>
    %45 = arith.truncf %44 : vector<8x6xf32> to vector<8x6xbf16>
    %c7 = arith.constant 7 : index
    %c0_38 = arith.constant 0 : index
    %c0_39 = arith.constant 0 : index
    %46 = vector.load %arg25[%c7, %c0_38, %c0_39] : memref<24x6x128xbf16, #tpu.memory_space<vmem>>, vector<1x6x128xbf16>
    %47 = vector.shape_cast %46 : vector<1x6x128xbf16> to vector<6x128xbf16>
    %cst_40 = arith.constant dense<0.000000e+00> : vector<8x128xf32>
    %48 = tpu.matmul %45, %47, %cst_40 {dimension_numbers = #tpu.dot_dimension_numbers<[1], [0], [0], [1], [0, 0, 1, 1], [], []>} : vector<8x6xbf16>, vector<6x128xbf16>, vector<8x128xf32> -> vector<8x128xf32>
    %49 = arith.addf %43, %48 : vector<8x128xf32>
    %c0_41 = arith.constant 0 : index
    %c0_42 = arith.constant 0 : index
    %50 = vector.load %arg9[%c0_41, %c0_42] : memref<8x6xf32, #tpu.memory_space<vmem>>, vector<8x6xf32>
    %51 = arith.truncf %50 : vector<8x6xf32> to vector<8x6xbf16>
    %c8 = arith.constant 8 : index
    %c0_43 = arith.constant 0 : index
    %c0_44 = arith.constant 0 : index
    %52 = vector.load %arg25[%c8, %c0_43, %c0_44] : memref<24x6x128xbf16, #tpu.memory_space<vmem>>, vector<1x6x128xbf16>
    %53 = vector.shape_cast %52 : vector<1x6x128xbf16> to vector<6x128xbf16>
    %cst_45 = arith.constant dense<0.000000e+00> : vector<8x128xf32>
    %54 = tpu.matmul %51, %53, %cst_45 {dimension_numbers = #tpu.dot_dimension_numbers<[1], [0], [0], [1], [0, 0, 1, 1], [], []>} : vector<8x6xbf16>, vector<6x128xbf16>, vector<8x128xf32> -> vector<8x128xf32>
    %55 = arith.addf %49, %54 : vector<8x128xf32>
    %c0_46 = arith.constant 0 : index
    %c0_47 = arith.constant 0 : index
    %56 = vector.load %arg10[%c0_46, %c0_47] : memref<8x6xf32, #tpu.memory_space<vmem>>, vector<8x6xf32>
    %57 = arith.truncf %56 : vector<8x6xf32> to vector<8x6xbf16>
    %c9 = arith.constant 9 : index
    %c0_48 = arith.constant 0 : index
    %c0_49 = arith.constant 0 : index
    %58 = vector.load %arg25[%c9, %c0_48, %c0_49] : memref<24x6x128xbf16, #tpu.memory_space<vmem>>, vector<1x6x128xbf16>
    %59 = vector.shape_cast %58 : vector<1x6x128xbf16> to vector<6x128xbf16>
    %cst_50 = arith.constant dense<0.000000e+00> : vector<8x128xf32>
    %60 = tpu.matmul %57, %59, %cst_50 {dimension_numbers = #tpu.dot_dimension_numbers<[1], [0], [0], [1], [0, 0, 1, 1], [], []>} : vector<8x6xbf16>, vector<6x128xbf16>, vector<8x128xf32> -> vector<8x128xf32>
    %61 = arith.addf %55, %60 : vector<8x128xf32>
    %c0_51 = arith.constant 0 : index
    %c0_52 = arith.constant 0 : index
    %62 = vector.load %arg11[%c0_51, %c0_52] : memref<8x6xf32, #tpu.memory_space<vmem>>, vector<8x6xf32>
    %63 = arith.truncf %62 : vector<8x6xf32> to vector<8x6xbf16>
    %c10 = arith.constant 10 : index
    %c0_53 = arith.constant 0 : index
    %c0_54 = arith.constant 0 : index
    %64 = vector.load %arg25[%c10, %c0_53, %c0_54] : memref<24x6x128xbf16, #tpu.memory_space<vmem>>, vector<1x6x128xbf16>
    %65 = vector.shape_cast %64 : vector<1x6x128xbf16> to vector<6x128xbf16>
    %cst_55 = arith.constant dense<0.000000e+00> : vector<8x128xf32>
    %66 = tpu.matmul %63, %65, %cst_55 {dimension_numbers = #tpu.dot_dimension_numbers<[1], [0], [0], [1], [0, 0, 1, 1], [], []>} : vector<8x6xbf16>, vector<6x128xbf16>, vector<8x128xf32> -> vector<8x128xf32>
    %67 = arith.addf %61, %66 : vector<8x128xf32>
    %c0_56 = arith.constant 0 : index
    %c0_57 = arith.constant 0 : index
    %68 = vector.load %arg12[%c0_56, %c0_57] : memref<8x6xf32, #tpu.memory_space<vmem>>, vector<8x6xf32>
    %69 = arith.truncf %68 : vector<8x6xf32> to vector<8x6xbf16>
    %c11 = arith.constant 11 : index
    %c0_58 = arith.constant 0 : index
    %c0_59 = arith.constant 0 : index
    %70 = vector.load %arg25[%c11, %c0_58, %c0_59] : memref<24x6x128xbf16, #tpu.memory_space<vmem>>, vector<1x6x128xbf16>
    %71 = vector.shape_cast %70 : vector<1x6x128xbf16> to vector<6x128xbf16>
    %cst_60 = arith.constant dense<0.000000e+00> : vector<8x128xf32>
    %72 = tpu.matmul %69, %71, %cst_60 {dimension_numbers = #tpu.dot_dimension_numbers<[1], [0], [0], [1], [0, 0, 1, 1], [], []>} : vector<8x6xbf16>, vector<6x128xbf16>, vector<8x128xf32> -> vector<8x128xf32>
    %73 = arith.addf %67, %72 : vector<8x128xf32>
    %c0_61 = arith.constant 0 : index
    %c0_62 = arith.constant 0 : index
    %74 = vector.load %arg13[%c0_61, %c0_62] : memref<8x6xf32, #tpu.memory_space<vmem>>, vector<8x6xf32>
    %75 = arith.truncf %74 : vector<8x6xf32> to vector<8x6xbf16>
    %c12 = arith.constant 12 : index
    %c0_63 = arith.constant 0 : index
    %c0_64 = arith.constant 0 : index
    %76 = vector.load %arg25[%c12, %c0_63, %c0_64] : memref<24x6x128xbf16, #tpu.memory_space<vmem>>, vector<1x6x128xbf16>
    %77 = vector.shape_cast %76 : vector<1x6x128xbf16> to vector<6x128xbf16>
    %cst_65 = arith.constant dense<0.000000e+00> : vector<8x128xf32>
    %78 = tpu.matmul %75, %77, %cst_65 {dimension_numbers = #tpu.dot_dimension_numbers<[1], [0], [0], [1], [0, 0, 1, 1], [], []>} : vector<8x6xbf16>, vector<6x128xbf16>, vector<8x128xf32> -> vector<8x128xf32>
    %79 = arith.addf %73, %78 : vector<8x128xf32>
    %c0_66 = arith.constant 0 : index
    %c0_67 = arith.constant 0 : index
    %80 = vector.load %arg14[%c0_66, %c0_67] : memref<8x6xf32, #tpu.memory_space<vmem>>, vector<8x6xf32>
    %81 = arith.truncf %80 : vector<8x6xf32> to vector<8x6xbf16>
    %c13 = arith.constant 13 : index
    %c0_68 = arith.constant 0 : index
    %c0_69 = arith.constant 0 : index
    %82 = vector.load %arg25[%c13, %c0_68, %c0_69] : memref<24x6x128xbf16, #tpu.memory_space<vmem>>, vector<1x6x128xbf16>
    %83 = vector.shape_cast %82 : vector<1x6x128xbf16> to vector<6x128xbf16>
    %cst_70 = arith.constant dense<0.000000e+00> : vector<8x128xf32>
    %84 = tpu.matmul %81, %83, %cst_70 {dimension_numbers = #tpu.dot_dimension_numbers<[1], [0], [0], [1], [0, 0, 1, 1], [], []>} : vector<8x6xbf16>, vector<6x128xbf16>, vector<8x128xf32> -> vector<8x128xf32>
    %85 = arith.addf %79, %84 : vector<8x128xf32>
    %c0_71 = arith.constant 0 : index
    %c0_72 = arith.constant 0 : index
    %86 = vector.load %arg15[%c0_71, %c0_72] : memref<8x6xf32, #tpu.memory_space<vmem>>, vector<8x6xf32>
    %87 = arith.truncf %86 : vector<8x6xf32> to vector<8x6xbf16>
    %c14 = arith.constant 14 : index
    %c0_73 = arith.constant 0 : index
    %c0_74 = arith.constant 0 : index
    %88 = vector.load %arg25[%c14, %c0_73, %c0_74] : memref<24x6x128xbf16, #tpu.memory_space<vmem>>, vector<1x6x128xbf16>
    %89 = vector.shape_cast %88 : vector<1x6x128xbf16> to vector<6x128xbf16>
    %cst_75 = arith.constant dense<0.000000e+00> : vector<8x128xf32>
    %90 = tpu.matmul %87, %89, %cst_75 {dimension_numbers = #tpu.dot_dimension_numbers<[1], [0], [0], [1], [0, 0, 1, 1], [], []>} : vector<8x6xbf16>, vector<6x128xbf16>, vector<8x128xf32> -> vector<8x128xf32>
    %91 = arith.addf %85, %90 : vector<8x128xf32>
    %c0_76 = arith.constant 0 : index
    %c0_77 = arith.constant 0 : index
    %92 = vector.load %arg16[%c0_76, %c0_77] : memref<8x6xf32, #tpu.memory_space<vmem>>, vector<8x6xf32>
    %93 = arith.truncf %92 : vector<8x6xf32> to vector<8x6xbf16>
    %c15 = arith.constant 15 : index
    %c0_78 = arith.constant 0 : index
    %c0_79 = arith.constant 0 : index
    %94 = vector.load %arg25[%c15, %c0_78, %c0_79] : memref<24x6x128xbf16, #tpu.memory_space<vmem>>, vector<1x6x128xbf16>
    %95 = vector.shape_cast %94 : vector<1x6x128xbf16> to vector<6x128xbf16>
    %cst_80 = arith.constant dense<0.000000e+00> : vector<8x128xf32>
    %96 = tpu.matmul %93, %95, %cst_80 {dimension_numbers = #tpu.dot_dimension_numbers<[1], [0], [0], [1], [0, 0, 1, 1], [], []>} : vector<8x6xbf16>, vector<6x128xbf16>, vector<8x128xf32> -> vector<8x128xf32>
    %97 = arith.addf %91, %96 : vector<8x128xf32>
    %c0_81 = arith.constant 0 : index
    %c0_82 = arith.constant 0 : index
    %98 = vector.load %arg17[%c0_81, %c0_82] : memref<8x6xf32, #tpu.memory_space<vmem>>, vector<8x6xf32>
    %99 = arith.truncf %98 : vector<8x6xf32> to vector<8x6xbf16>
    %c16 = arith.constant 16 : index
    %c0_83 = arith.constant 0 : index
    %c0_84 = arith.constant 0 : index
    %100 = vector.load %arg25[%c16, %c0_83, %c0_84] : memref<24x6x128xbf16, #tpu.memory_space<vmem>>, vector<1x6x128xbf16>
    %101 = vector.shape_cast %100 : vector<1x6x128xbf16> to vector<6x128xbf16>
    %cst_85 = arith.constant dense<0.000000e+00> : vector<8x128xf32>
    %102 = tpu.matmul %99, %101, %cst_85 {dimension_numbers = #tpu.dot_dimension_numbers<[1], [0], [0], [1], [0, 0, 1, 1], [], []>} : vector<8x6xbf16>, vector<6x128xbf16>, vector<8x128xf32> -> vector<8x128xf32>
    %103 = arith.addf %97, %102 : vector<8x128xf32>
    %c0_86 = arith.constant 0 : index
    %c0_87 = arith.constant 0 : index
    %104 = vector.load %arg18[%c0_86, %c0_87] : memref<8x6xf32, #tpu.memory_space<vmem>>, vector<8x6xf32>
    %105 = arith.truncf %104 : vector<8x6xf32> to vector<8x6xbf16>
    %c17 = arith.constant 17 : index
    %c0_88 = arith.constant 0 : index
    %c0_89 = arith.constant 0 : index
    %106 = vector.load %arg25[%c17, %c0_88, %c0_89] : memref<24x6x128xbf16, #tpu.memory_space<vmem>>, vector<1x6x128xbf16>
    %107 = vector.shape_cast %106 : vector<1x6x128xbf16> to vector<6x128xbf16>
    %cst_90 = arith.constant dense<0.000000e+00> : vector<8x128xf32>
    %108 = tpu.matmul %105, %107, %cst_90 {dimension_numbers = #tpu.dot_dimension_numbers<[1], [0], [0], [1], [0, 0, 1, 1], [], []>} : vector<8x6xbf16>, vector<6x128xbf16>, vector<8x128xf32> -> vector<8x128xf32>
    %109 = arith.addf %103, %108 : vector<8x128xf32>
    %c0_91 = arith.constant 0 : index
    %c0_92 = arith.constant 0 : index
    %110 = vector.load %arg19[%c0_91, %c0_92] : memref<8x6xf32, #tpu.memory_space<vmem>>, vector<8x6xf32>
    %111 = arith.truncf %110 : vector<8x6xf32> to vector<8x6xbf16>
    %c18 = arith.constant 18 : index
    %c0_93 = arith.constant 0 : index
    %c0_94 = arith.constant 0 : index
    %112 = vector.load %arg25[%c18, %c0_93, %c0_94] : memref<24x6x128xbf16, #tpu.memory_space<vmem>>, vector<1x6x128xbf16>
    %113 = vector.shape_cast %112 : vector<1x6x128xbf16> to vector<6x128xbf16>
    %cst_95 = arith.constant dense<0.000000e+00> : vector<8x128xf32>
    %114 = tpu.matmul %111, %113, %cst_95 {dimension_numbers = #tpu.dot_dimension_numbers<[1], [0], [0], [1], [0, 0, 1, 1], [], []>} : vector<8x6xbf16>, vector<6x128xbf16>, vector<8x128xf32> -> vector<8x128xf32>
    %115 = arith.addf %109, %114 : vector<8x128xf32>
    %c0_96 = arith.constant 0 : index
    %c0_97 = arith.constant 0 : index
    %116 = vector.load %arg20[%c0_96, %c0_97] : memref<8x6xf32, #tpu.memory_space<vmem>>, vector<8x6xf32>
    %117 = arith.truncf %116 : vector<8x6xf32> to vector<8x6xbf16>
    %c19 = arith.constant 19 : index
    %c0_98 = arith.constant 0 : index
    %c0_99 = arith.constant 0 : index
    %118 = vector.load %arg25[%c19, %c0_98, %c0_99] : memref<24x6x128xbf16, #tpu.memory_space<vmem>>, vector<1x6x128xbf16>
    %119 = vector.shape_cast %118 : vector<1x6x128xbf16> to vector<6x128xbf16>
    %cst_100 = arith.constant dense<0.000000e+00> : vector<8x128xf32>
    %120 = tpu.matmul %117, %119, %cst_100 {dimension_numbers = #tpu.dot_dimension_numbers<[1], [0], [0], [1], [0, 0, 1, 1], [], []>} : vector<8x6xbf16>, vector<6x128xbf16>, vector<8x128xf32> -> vector<8x128xf32>
    %121 = arith.addf %115, %120 : vector<8x128xf32>
    %c0_101 = arith.constant 0 : index
    %c0_102 = arith.constant 0 : index
    %122 = vector.load %arg21[%c0_101, %c0_102] : memref<8x6xf32, #tpu.memory_space<vmem>>, vector<8x6xf32>
    %123 = arith.truncf %122 : vector<8x6xf32> to vector<8x6xbf16>
    %c20 = arith.constant 20 : index
    %c0_103 = arith.constant 0 : index
    %c0_104 = arith.constant 0 : index
    %124 = vector.load %arg25[%c20, %c0_103, %c0_104] : memref<24x6x128xbf16, #tpu.memory_space<vmem>>, vector<1x6x128xbf16>
    %125 = vector.shape_cast %124 : vector<1x6x128xbf16> to vector<6x128xbf16>
    %cst_105 = arith.constant dense<0.000000e+00> : vector<8x128xf32>
    %126 = tpu.matmul %123, %125, %cst_105 {dimension_numbers = #tpu.dot_dimension_numbers<[1], [0], [0], [1], [0, 0, 1, 1], [], []>} : vector<8x6xbf16>, vector<6x128xbf16>, vector<8x128xf32> -> vector<8x128xf32>
    %127 = arith.addf %121, %126 : vector<8x128xf32>
    %c0_106 = arith.constant 0 : index
    %c0_107 = arith.constant 0 : index
    %128 = vector.load %arg22[%c0_106, %c0_107] : memref<8x6xf32, #tpu.memory_space<vmem>>, vector<8x6xf32>
    %129 = arith.truncf %128 : vector<8x6xf32> to vector<8x6xbf16>
    %c21 = arith.constant 21 : index
    %c0_108 = arith.constant 0 : index
    %c0_109 = arith.constant 0 : index
    %130 = vector.load %arg25[%c21, %c0_108, %c0_109] : memref<24x6x128xbf16, #tpu.memory_space<vmem>>, vector<1x6x128xbf16>
    %131 = vector.shape_cast %130 : vector<1x6x128xbf16> to vector<6x128xbf16>
    %cst_110 = arith.constant dense<0.000000e+00> : vector<8x128xf32>
    %132 = tpu.matmul %129, %131, %cst_110 {dimension_numbers = #tpu.dot_dimension_numbers<[1], [0], [0], [1], [0, 0, 1, 1], [], []>} : vector<8x6xbf16>, vector<6x128xbf16>, vector<8x128xf32> -> vector<8x128xf32>
    %133 = arith.addf %127, %132 : vector<8x128xf32>
    %c0_111 = arith.constant 0 : index
    %c0_112 = arith.constant 0 : index
    %134 = vector.load %arg23[%c0_111, %c0_112] : memref<8x6xf32, #tpu.memory_space<vmem>>, vector<8x6xf32>
    %135 = arith.truncf %134 : vector<8x6xf32> to vector<8x6xbf16>
    %c22 = arith.constant 22 : index
    %c0_113 = arith.constant 0 : index
    %c0_114 = arith.constant 0 : index
    %136 = vector.load %arg25[%c22, %c0_113, %c0_114] : memref<24x6x128xbf16, #tpu.memory_space<vmem>>, vector<1x6x128xbf16>
    %137 = vector.shape_cast %136 : vector<1x6x128xbf16> to vector<6x128xbf16>
    %cst_115 = arith.constant dense<0.000000e+00> : vector<8x128xf32>
    %138 = tpu.matmul %135, %137, %cst_115 {dimension_numbers = #tpu.dot_dimension_numbers<[1], [0], [0], [1], [0, 0, 1, 1], [], []>} : vector<8x6xbf16>, vector<6x128xbf16>, vector<8x128xf32> -> vector<8x128xf32>
    %139 = arith.addf %133, %138 : vector<8x128xf32>
    %c0_116 = arith.constant 0 : index
    %c0_117 = arith.constant 0 : index
    %140 = vector.load %arg24[%c0_116, %c0_117] : memref<8x6xf32, #tpu.memory_space<vmem>>, vector<8x6xf32>
    %141 = arith.truncf %140 : vector<8x6xf32> to vector<8x6xbf16>
    %c23 = arith.constant 23 : index
    %c0_118 = arith.constant 0 : index
    %c0_119 = arith.constant 0 : index
    %142 = vector.load %arg25[%c23, %c0_118, %c0_119] : memref<24x6x128xbf16, #tpu.memory_space<vmem>>, vector<1x6x128xbf16>
    %143 = vector.shape_cast %142 : vector<1x6x128xbf16> to vector<6x128xbf16>
    %cst_120 = arith.constant dense<0.000000e+00> : vector<8x128xf32>
    %144 = tpu.matmul %141, %143, %cst_120 {dimension_numbers = #tpu.dot_dimension_numbers<[1], [0], [0], [1], [0, 0, 1, 1], [], []>} : vector<8x6xbf16>, vector<6x128xbf16>, vector<8x128xf32> -> vector<8x128xf32>
    %145 = arith.addf %139, %144 : vector<8x128xf32>
    %cst_121 = arith.constant 0.000000e+00 : f32
    %146 = vector.broadcast %cst_121 : f32 to vector<8x128xf32>
    %147 = arith.maximumf %145, %146 : vector<8x128xf32>
    %148 = arith.truncf %147 : vector<8x128xf32> to vector<8x128xbf16>
    %c0_122 = arith.constant 0 : index
    %c0_123 = arith.constant 0 : index
    %149 = vector.load %arg27[%c0_122, %c0_123] : memref<128x256xbf16, #tpu.memory_space<vmem>>, vector<128x256xbf16>
    %cst_124 = arith.constant dense<0.000000e+00> : vector<8x256xf32>
    %150 = tpu.matmul %148, %149, %cst_124 {dimension_numbers = #tpu.dot_dimension_numbers<[1], [0], [0], [1], [0, 0, 1, 1], [], []>} : vector<8x128xbf16>, vector<128x256xbf16>, vector<8x256xf32> -> vector<8x256xf32>
    %c0_125 = arith.constant 0 : index
    %c0_126 = arith.constant 0 : index
    %151 = vector.load %arg28[%c0_125, %c0_126] : memref<1x256xf32, #tpu.memory_space<vmem>>, vector<1x256xf32>
    %152 = vector.broadcast %151 : vector<1x256xf32> to vector<8x256xf32>
    %153 = arith.addf %150, %152 : vector<8x256xf32>
    %cst_127 = arith.constant 0.000000e+00 : f32
    %154 = vector.broadcast %cst_127 : f32 to vector<8x256xf32>
    %155 = arith.maximumf %153, %154 : vector<8x256xf32>
    %156 = arith.truncf %155 : vector<8x256xf32> to vector<8x256xbf16>
    %c0_128 = arith.constant 0 : index
    %c0_129 = arith.constant 0 : index
    %157 = vector.load %arg29[%c0_128, %c0_129] : memref<256x64xbf16, #tpu.memory_space<vmem>>, vector<256x64xbf16>
    %cst_130 = arith.constant dense<0.000000e+00> : vector<8x64xf32>
    %158 = tpu.matmul %156, %157, %cst_130 {dimension_numbers = #tpu.dot_dimension_numbers<[1], [0], [0], [1], [0, 0, 1, 1], [], []>} : vector<8x256xbf16>, vector<256x64xbf16>, vector<8x64xf32> -> vector<8x64xf32>
    %c0_131 = arith.constant 0 : index
    %c0_132 = arith.constant 0 : index
    %159 = vector.load %arg30[%c0_131, %c0_132] : memref<1x64xf32, #tpu.memory_space<vmem>>, vector<1x64xf32>
    %160 = vector.broadcast %159 : vector<1x64xf32> to vector<8x64xf32>
    %161 = arith.addf %158, %160 : vector<8x64xf32>
    %cst_133 = arith.constant 0.000000e+00 : f32
    %162 = vector.broadcast %cst_133 : f32 to vector<8x64xf32>
    %163 = arith.maximumf %161, %162 : vector<8x64xf32>
    %164 = arith.truncf %163 : vector<8x64xf32> to vector<8x64xbf16>
    %c0_134 = arith.constant 0 : index
    %c0_135 = arith.constant 0 : index
    %165 = vector.load %arg31[%c0_134, %c0_135] : memref<64x8xbf16, #tpu.memory_space<vmem>>, vector<64x8xbf16>
    %cst_136 = arith.constant dense<0.000000e+00> : vector<8x8xf32>
    %166 = tpu.matmul %164, %165, %cst_136 {dimension_numbers = #tpu.dot_dimension_numbers<[1], [0], [0], [1], [0, 0, 1, 1], [], []>} : vector<8x64xbf16>, vector<64x8xbf16>, vector<8x8xf32> -> vector<8x8xf32>
    %c0_137 = arith.constant 0 : index
    %c0_138 = arith.constant 0 : index
    %167 = vector.load %arg32[%c0_137, %c0_138] : memref<1x8xf32, #tpu.memory_space<vmem>>, vector<1x8xf32>
    %168 = vector.broadcast %167 : vector<1x8xf32> to vector<8x8xf32>
    %169 = arith.addf %166, %168 : vector<8x8xf32>
    %c0_139 = arith.constant 0 : index
    %c0_140 = arith.constant 0 : index
    %170 = vector.load %arg33[%c0_139, %c0_140] : memref<8x8xf32, #tpu.memory_space<vmem>>, vector<8x8xf32>
    tpu.vector_store %arg33[%c0_139, %c0_140], %169 {strides = array<i32>} : memref<8x8xf32, #tpu.memory_space<vmem>>, vector<8x8xf32>,
    return
  }
  func.func @transform_0(%arg0: i32) -> (i32, i32) {
    %c0_i32 = arith.constant 0 : i32
    %c0_i32_0 = arith.constant 0 : i32
    return %arg0, %c0_i32 : i32, i32
  }
  func.func @transform_1(%arg0: i32) -> (i32, i32) {
    %c0_i32 = arith.constant 0 : i32
    %c0_i32_0 = arith.constant 0 : i32
    return %arg0, %c0_i32 : i32, i32
  }
  func.func @transform_2(%arg0: i32) -> (i32, i32) {
    %c0_i32 = arith.constant 0 : i32
    %c0_i32_0 = arith.constant 0 : i32
    return %arg0, %c0_i32 : i32, i32
  }
  func.func @transform_3(%arg0: i32) -> (i32, i32) {
    %c0_i32 = arith.constant 0 : i32
    %c0_i32_0 = arith.constant 0 : i32
    return %arg0, %c0_i32 : i32, i32
  }
  func.func @transform_4(%arg0: i32) -> (i32, i32) {
    %c0_i32 = arith.constant 0 : i32
    %c0_i32_0 = arith.constant 0 : i32
    return %arg0, %c0_i32 : i32, i32
  }
  func.func @transform_5(%arg0: i32) -> (i32, i32) {
    %c0_i32 = arith.constant 0 : i32
    %c0_i32_0 = arith.constant 0 : i32
    return %arg0, %c0_i32 : i32, i32
  }
  func.func @transform_6(%arg0: i32) -> (i32, i32) {
    %c0_i32 = arith.constant 0 : i32
    %c0_i32_0 = arith.constant 0 : i32
    return %arg0, %c0_i32 : i32, i32
  }
  func.func @transform_7(%arg0: i32) -> (i32, i32) {
    %c0_i32 = arith.constant 0 : i32
    %c0_i32_0 = arith.constant 0 : i32
    return %arg0, %c0_i32 : i32, i32
  }
  func.func @transform_8(%arg0: i32) -> (i32, i32) {
    %c0_i32 = arith.constant 0 : i32
    %c0_i32_0 = arith.constant 0 : i32
    return %arg0, %c0_i32 : i32, i32
  }
  func.func @transform_9(%arg0: i32) -> (i32, i32) {
    %c0_i32 = arith.constant 0 : i32
    %c0_i32_0 = arith.constant 0 : i32
    return %arg0, %c0_i32 : i32, i32
  }
  func.func @transform_10(%arg0: i32) -> (i32, i32) {
    %c0_i32 = arith.constant 0 : i32
    %c0_i32_0 = arith.constant 0 : i32
    return %arg0, %c0_i32 : i32, i32
  }
  func.func @transform_11(%arg0: i32) -> (i32, i32) {
    %c0_i32 = arith.constant 0 : i32
    %c0_i32_0 = arith.constant 0 : i32
    return %arg0, %c0_i32 : i32, i32
  }
  func.func @transform_12(%arg0: i32) -> (i32, i32) {
    %c0_i32 = arith.constant 0 : i32
    %c0_i32_0 = arith.constant 0 : i32
    return %arg0, %c0_i32 : i32, i32
  }
  func.func @transform_13(%arg0: i32) -> (i32, i32) {
    %c0_i32 = arith.constant 0 : i32
    %c0_i32_0 = arith.constant 0 : i32
    return %arg0, %c0_i32 : i32, i32
  }
  func.func @transform_14(%arg0: i32) -> (i32, i32) {
    %c0_i32 = arith.constant 0 : i32
    %c0_i32_0 = arith.constant 0 : i32
    return %arg0, %c0_i32 : i32, i32
  }
  func.func @transform_15(%arg0: i32) -> (i32, i32) {
    %c0_i32 = arith.constant 0 : i32
    %c0_i32_0 = arith.constant 0 : i32
    return %arg0, %c0_i32 : i32, i32
  }
  func.func @transform_16(%arg0: i32) -> (i32, i32) {
    %c0_i32 = arith.constant 0 : i32
    %c0_i32_0 = arith.constant 0 : i32
    return %arg0, %c0_i32 : i32, i32
  }
  func.func @transform_17(%arg0: i32) -> (i32, i32) {
    %c0_i32 = arith.constant 0 : i32
    %c0_i32_0 = arith.constant 0 : i32
    return %arg0, %c0_i32 : i32, i32
  }
  func.func @transform_18(%arg0: i32) -> (i32, i32) {
    %c0_i32 = arith.constant 0 : i32
    %c0_i32_0 = arith.constant 0 : i32
    return %arg0, %c0_i32 : i32, i32
  }
  func.func @transform_19(%arg0: i32) -> (i32, i32) {
    %c0_i32 = arith.constant 0 : i32
    %c0_i32_0 = arith.constant 0 : i32
    return %arg0, %c0_i32 : i32, i32
  }
  func.func @transform_20(%arg0: i32) -> (i32, i32) {
    %c0_i32 = arith.constant 0 : i32
    %c0_i32_0 = arith.constant 0 : i32
    return %arg0, %c0_i32 : i32, i32
  }
  func.func @transform_21(%arg0: i32) -> (i32, i32) {
    %c0_i32 = arith.constant 0 : i32
    %c0_i32_0 = arith.constant 0 : i32
    return %arg0, %c0_i32 : i32, i32
  }
  func.func @transform_22(%arg0: i32) -> (i32, i32) {
    %c0_i32 = arith.constant 0 : i32
    %c0_i32_0 = arith.constant 0 : i32
    return %arg0, %c0_i32 : i32, i32
  }
  func.func @transform_23(%arg0: i32) -> (i32, i32) {
    %c0_i32 = arith.constant 0 : i32
    %c0_i32_0 = arith.constant 0 : i32
    return %arg0, %c0_i32 : i32, i32
  }
  func.func @transform_24(%arg0: i32) -> (i32, i32, i32) {
    %c0_i32 = arith.constant 0 : i32
    %c0_i32_0 = arith.constant 0 : i32
    %c0_i32_1 = arith.constant 0 : i32
    %c0_i32_2 = arith.constant 0 : i32
    return %c0_i32, %c0_i32_0, %c0_i32_1 : i32, i32, i32
  }
  func.func @transform_25(%arg0: i32) -> (i32, i32) {
    %c0_i32 = arith.constant 0 : i32
    %c0_i32_0 = arith.constant 0 : i32
    %c0_i32_1 = arith.constant 0 : i32
    return %c0_i32, %c0_i32_0 : i32, i32
  }
  func.func @transform_26(%arg0: i32) -> (i32, i32) {
    %c0_i32 = arith.constant 0 : i32
    %c0_i32_0 = arith.constant 0 : i32
    %c0_i32_1 = arith.constant 0 : i32
    return %c0_i32, %c0_i32_0 : i32, i32
  }
  func.func @transform_27(%arg0: i32) -> (i32, i32) {
    %c0_i32 = arith.constant 0 : i32
    %c0_i32_0 = arith.constant 0 : i32
    %c0_i32_1 = arith.constant 0 : i32
    return %c0_i32, %c0_i32_0 : i32, i32
  }
  func.func @transform_28(%arg0: i32) -> (i32, i32) {
    %c0_i32 = arith.constant 0 : i32
    %c0_i32_0 = arith.constant 0 : i32
    %c0_i32_1 = arith.constant 0 : i32
    return %c0_i32, %c0_i32_0 : i32, i32
  }
  func.func @transform_29(%arg0: i32) -> (i32, i32) {
    %c0_i32 = arith.constant 0 : i32
    %c0_i32_0 = arith.constant 0 : i32
    %c0_i32_1 = arith.constant 0 : i32
    return %c0_i32, %c0_i32_0 : i32, i32
  }
  func.func @transform_30(%arg0: i32) -> (i32, i32) {
    %c0_i32 = arith.constant 0 : i32
    %c0_i32_0 = arith.constant 0 : i32
    %c0_i32_1 = arith.constant 0 : i32
    return %c0_i32, %c0_i32_0 : i32, i32
  }
  func.func @transform_31(%arg0: i32) -> (i32, i32) {
    %c0_i32 = arith.constant 0 : i32
    %c0_i32_0 = arith.constant 0 : i32
    %c0_i32_1 = arith.constant 0 : i32
    return %c0_i32, %c0_i32_0 : i32, i32
  }
  func.func @transform_32(%arg0: i32) -> (i32, i32) {
    %c0_i32 = arith.constant 0 : i32
    %c0_i32_0 = arith.constant 0 : i32
    return %arg0, %c0_i32 : i32, i32
  }
}

</mosaic_0001>

<bundles_post_ra>
// kernel: tpu_custom_call.1
= control target key start
LH: loop header
LB: loop body
LE: loop exit
PB: predicated region body
PF: predicated region fallthrough
CT: control target
= control target key end

     0   :  { %s2354_s6 = smov 1   ;;  %s2355_s10 = smov 2   ;;  %s2778_s0 = inlined_call_operand.smem [shape: u32[33], index: -1, kind: input, shape index: {}] }
   0x1   :  { %s2401_s5 = sld [smem:[%s2778_s0]]   ;;  %s2356_s14 = smov 3  }
   0x2   :  { %s2406_s9 = sld [smem:[%s2778_s0 + %s2354_s6]]   ;;  %s2357_s18 = smov 4  }
   0x3   :  { %s2411_s13 = sld [smem:[%s2778_s0 + %s2355_s10]]   ;;  %s2358_s22 = smov 5  }
   0x4   :  { %s2416_s17 = sld [smem:[%s2778_s0 + %s2356_s14]]   ;;  %s2359_s26 = smov 6  }
   0x5   :  { %s2421_s21 = sld [smem:[%s2778_s0 + %s2357_s18]]   ;;  %s2360_s30 = smov 7  }
   0x6   :  { %s2426_s25 = sld [smem:[%s2778_s0 + %s2358_s22]]   ;;  %s2361_s4 = smov 8  }
   0x7   :  { %s2431_s29 = sld [smem:[%s2778_s0 + %s2359_s26]]   ;;  %s2362_s10 = smov 9  }
   0x8   :  { %s2436_s3 = sld [smem:[%s2778_s0 + %s2360_s30]]   ;;  %s2363_s15 = smov 10  }
   0x9   :  { %s2441_s8 = sld [smem:[%s2778_s0 + %s2361_s4]]   ;;  %s2364_s20 = smov 11  }
   0xa   :  { %s2446_s14 = sld [smem:[%s2778_s0 + %s2362_s10]]   ;;  %s2365_s26 = smov 12  }
   0xb   :  { %s2451_s19 = sld [smem:[%s2778_s0 + %s2363_s15]]   ;;  %s2366_s1 = smov 13  }
   0xc   :  { %s2456_s24 = sld [smem:[%s2778_s0 + %s2364_s20]]   ;;  %s2367_s7 = smov 14  }
   0xd   :  { %s2461_s30 = sld [smem:[%s2778_s0 + %s2365_s26]]   ;;  %s2368_s15 = smov 15  }
   0xe   :  { %s2466_s6 = sld [smem:[%s2778_s0 + %s2366_s1]]   ;;  %s2369_s22 = smov 16  }
   0xf   :  { %s2471_s12 = sld [smem:[%s2778_s0 + %s2367_s7]]   ;;  %s2370_s28 = smov 17  }
  0x10   :  { %2781 = sst [smem:[#allocation12_spill]] %s2446_s14  ;;  %s2371_s7 = smov 18  }
  0x11   :  { %s2476_s20 = sld [smem:[%s2778_s0 + %s2368_s15]]   ;;  %s2372_s15 = smov 19  }
  0x12   :  { %2782 = sst [smem:[#allocation13_spill]] %s2456_s24 }
  0x13   :  { %2783 = sst [smem:[#allocation14_spill]] %s2461_s30 }
  0x14   :  { %2784 = sst [smem:[#allocation15_spill]] %s2466_s6 }
  0x15   :  { %2785 = sst [smem:[#allocation16_spill]] %s2471_s12 }
  0x16   :  { %s2481_s27 = sld [smem:[%s2778_s0 + %s2369_s22]]   ;;  %s2373_s22 = smov 20  }
  0x17   :  { %2786 = sst [smem:[#allocation17_spill]] %s2476_s20 }
  0x18   :  { %s2486_s4 = sld [smem:[%s2778_s0 + %s2370_s28]]   ;;  %s2374_s28 = smov 21  }
  0x19   :  { %s2491_s6 = sld [smem:[%s2778_s0 + %s2371_s7]]   ;;  %s2375_s7 = smov 22  }
  0x1a   :  { %s2496_s20 = sld [smem:[%s2778_s0 + %s2372_s15]]   ;;  %s2376_s15 = smov 23  }
  0x1c   :  { %2787 = sst [smem:[#allocation18_spill]] %s2481_s27 }
  0x1d   :  { %s2501_s27 = sld [smem:[%s2778_s0 + %s2373_s22]]   ;;  %s2377_s22 = smov 24  }
  0x1e   :  { %2788 = sst [smem:[#allocation19_spill]] %s2486_s4 }
  0x1f   :  { %2789 = sst [smem:[#allocation20_spill]] %s2491_s6 }
  0x20   :  { %2790 = sst [smem:[#allocation21_spill]] %s2496_s20 }
  0x21   :  { %s2506_s4 = sld [smem:[%s2778_s0 + %s2374_s28]]   ;;  %s2378_s28 = smov 25  }
  0x22   :  { %s2511_s6 = sld [smem:[%s2778_s0 + %s2375_s7]]   ;;  %s2379_s7 = smov 26  }
  0x23   :  { %2791 = sst [smem:[#allocation22_spill]] %s2501_s27 }
  0x24   :  { %s2516_s20 = sld [smem:[%s2778_s0 + %s2376_s15]]   ;;  %s2380_s15 = smov 27  }
  0x25   :  { %s2521_s27 = sld [smem:[%s2778_s0 + %s2377_s22]]   ;;  %s2381_s22 = smov 28  }
  0x26   :  { %s2526_s12 = sld [smem:[%s2778_s0 + %s2378_s28]]   ;;  %s2382_s28 = smov 29  }
  0x27   :  { %s2531_s24 = sld [smem:[%s2778_s0 + %s2379_s7]]   ;;  %s2383_s7 = smov 30  }
  0x28   :  { %s2536_s30 = sld [smem:[%s2778_s0 + %s2380_s15]]   ;;  %s2384_s15 = smov 31  }
  0x29   :  { %s2541_s14 = sld [smem:[%s2778_s0 + %s2381_s22]]   ;;  %s2385_s22 = smov 32  }
  0x2c   :  { %2792 = sst [smem:[#allocation23_spill]] %s2526_s12 }
  0x2d   :  { %2793 = sst [smem:[#allocation24_spill]] %s2531_s24 }
  0x2e   :  { %2794 = sst [smem:[#allocation25_spill]] %s2536_s30 }
  0x2f   :  { %2795 = sst [smem:[#allocation26_spill]] %s2541_s14 }
  0x30   :  { %s2546_s12 = sld [smem:[%s2778_s0 + %s2382_s28]]  }
  0x31   :  { %s2551_s24 = sld [smem:[%s2778_s0 + %s2383_s7]]  }
  0x32   :  { %s2556_s30 = sld [smem:[%s2778_s0 + %s2384_s15]]  }
  0x33   :  { %s2561_s14 = sld [smem:[%s2778_s0 + %s2385_s22]]  }
  0x34   :  { %70 = vsyncpa [#allocation3], 0 }
  0x35   :  { %71 = vsyncpa [#allocation6], 0 }
  0x36   :  { %72 = vsyncpa [#allocation4], 0  ;;  %s2386_s28 = smov [#allocation5]   ;;  %s2387_s2 = smov [#allocation2]  }
  0x37   :  { %s131_s1 = sshll.u32 %s2386_s28, 4  ;;  %s121_s7 = sshll.u32 %s2387_s2, 4  ;;  %s132_s1 = int_to_ptr.vmem [resolvable:$true] %s131_s1  ;;  %s122_s7 = int_to_ptr.vmem [resolvable:$true] %s121_s7 }
  0x38   :  { %s2276_s10 = scalar_lea.vmem %s132_s1, 128  ;;  %p2281_p1 = scmp.lt.s32.totalorder %s132_s1, %s132_s1 }
  0x39   :  { %p2277_p0 = scmp.ne.s32.totalorder %s132_s1, %s2276_s10  ;;  %p2282_p2 = scmp.lt.s32.totalorder %s2276_s10, %s2276_s10 }
  0x3b   :  { %p2283_p3 = por %p2282_p2, %p2281_p1 }
  0x3d   :  { %p2284_p4 = pnand %p2283_p3, %p2277_p0 }
  0x3f   :  { %2287 = shalt.err (!%p2284_p4)
}
  0x40   :  { %134 = dma.hbm_to_vmem [thread:$0]  %s2511_s6, 128, %s132_s1, [#allocation6]  }
  0x41   :  { %s2296_s0 = scalar_lea.vmem %s122_s7, 128  ;;  %p2301_p6 = scmp.lt.s32.totalorder %s122_s7, %s122_s7 }
  0x42   :  { %p2297_p5 = scmp.ne.s32.totalorder %s122_s7, %s2296_s0  ;;  %p2302_p7 = scmp.lt.s32.totalorder %s2296_s0, %s2296_s0 }
  0x44   :  { %p2303_p8 = por %p2302_p7, %p2301_p6 }
  0x46   :  { %p2304_p9 = pnand %p2303_p8, %p2297_p5 }
  0x48   :  { %2307 = shalt.err (!%p2304_p9)
}
  0x49   :  { %124 = dma.hbm_to_vmem [thread:$0]  %s2506_s4, 128, %s122_s7, [#allocation3]  }
  0x4a   :  { %s2388_s11 = smov [#allocation7]  }
  0x4b   :  { %s141_s15 = sshll.u32 %s2388_s11, 4  ;;  %s142_s15 = int_to_ptr.vmem [resolvable:$true] %s141_s15 }
  0x4c   :  { %s2316_s16 = scalar_lea.vmem %s142_s15, 128  ;;  %p2321_p11 = scmp.lt.s32.totalorder %s142_s15, %s142_s15 }
  0x4d   :  { %p2317_p10 = scmp.ne.s32.totalorder %s142_s15, %s2316_s16  ;;  %p2322_p12 = scmp.lt.s32.totalorder %s2316_s16, %s2316_s16 }
  0x4f   :  { %p2323_p13 = por %p2322_p12, %p2321_p11 }
  0x51   :  { %p2324_p0 = pnand %p2323_p13, %p2317_p10 }
  0x53   :  { %2327 = shalt.err (!%p2324_p0)
}
  0x54   :  { %144 = dma.hbm_to_vmem [thread:$0]  %s2516_s20, 128, %s142_s15, [#allocation6]  }
  0x55   :  { %2348 = dma.done.wait [#allocation3], 128  }
  0x56   :  { %2349 = vsyncadd [#allocation3], 4294967168 }
  0x57   :  { %2350 = dma.done.wait [#allocation6], 256  }
  0x58   :  { %2351 = vsyncadd [#allocation6], 4294967040  ;;  %v2389_v0 = vmov 0.0   ;;  %vm2390_vm0 = vmmov 0   ;;  %vm185_vm1 = vcmask 1042432   ;;  %v171_v2 = vld [vmem:[%s2401_s5] sm:$0xff] }
  0x59   :  { %2029 = vmatprep.subr.bf16.mxu1 %v2389_v0  ;;  %2031 = vmatprep.mubr.msk.bf16.mxu1 %vm2390_vm0, %v2389_v0  ;;  %v173_v1 = vld [vmem:[%s2521_s27] sm:$0x7]  ;;  %v1869_v3 = vld [vmem:[%s2521_s27 + $0x4] sm:$0x7]  ;;  %v172_v5 = vpack.c.bf16 %v171_v2, %v171_v2  ;;  %v1871_v6 = vld [vmem:[%s2521_s27 + $0x8] sm:$0x7] }
  0x5a   :  { %2041 = vmatprep.subr.bf16.mxu0 %v2389_v0  ;;  %2043 = vmatprep.mubr.msk.bf16.mxu0 %vm2390_vm0, %v2389_v0  ;;  %v187_v4 = vsel %vm185_vm1, %v173_v1, 0  ;;  %v280_v7 = vld [vmem:[%s2411_s13] sm:$0xff]  ;;  %vm181_vm2 = vcmask 48128   ;;  %v288_v8 = vsel %vm185_vm1, %v1871_v6, 0  ;;  %v1875_v9 = vld [vmem:[%s2521_s27 + $0x10] sm:$0x7] }
  0x5b   :  { %2030 = vmatpush3.bf16.msra.mxu1 %v187_v4  ;;  %v237_v10 = vsel %vm185_vm1, %v1869_v3, 0  ;;  %2042 = vmatpush3.bf16.msra.mxu0 %v288_v8  ;;  %v281_v11 = vpack.c.bf16 %v280_v7, %v280_v7  ;;  %v390_v12 = vsel %vm185_vm1, %v1875_v9, 0  ;;  %v229_v13 = vld [vmem:[%s2406_s9] sm:$0xff]  ;;  %v1873_v14 = vld [vmem:[%s2521_s27 + $0xc] sm:$0x7]  ;;  %s2796_s5 = sld [smem:[#allocation12_spill]] }
  0x5c   :  { %2035 = vmatprep.subr.bf16.mxu1 %v2389_v0  ;;  %2053 = vmatprep.subr.bf16.mxu0 %v2389_v0  ;;  %v382_v15 = vld [vmem:[%s2421_s21] sm:$0xff]  ;;  %v230_v16 = vpack.c.bf16 %v229_v13, %v229_v13  ;;  %v1879_v17 = vld [vmem:[%s2521_s27 + $0x18] sm:$0x7]  ;;  %v339_v18 = vsel %vm185_vm1, %v1873_v14, 0  ;;  %v1877_v22 = vld [vmem:[%s2521_s27 + $0x14] sm:$0x7] }
  0x5d   :  { %v383_v19 = vpack.c.bf16 %v382_v15, %v382_v15  ;;  %v492_v20 = vsel %vm185_vm1, %v1879_v17, 0  ;;  %v331_v21 = vld [vmem:[%s2416_s17] sm:$0xff]  ;;  %v1881_v24 = vld [vmem:[%s2521_s27 + $0x1c] sm:$0x7]  ;;  %v1887_v26 = vld [vmem:[%s2521_s27 + $0x28] sm:$0x7] }
  0x5e   :  { %2032 = vmatmul.mubr.msk.bf16.vlgmr.msra.gmra.mxu1 %vm181_vm2, %v172_v5  ;;  %2044 = vmatmul.mubr.msk.bf16.vlgmr.msra.gmra.mxu0 %vm181_vm2, %v281_v11  ;;  %v484_v23 = vld [vmem:[%s2431_s29] sm:$0xff]  ;;  %v332_v27 = vpack.c.bf16 %v331_v21, %v331_v21  ;;  %v441_v28 = vsel %vm185_vm1, %v1877_v22, 0  ;;  %v543_v31 = vsel %vm185_vm1, %v1881_v24, 0  ;;  %v696_v33 = vsel %vm185_vm1, %v1887_v26, 0  ;;  %s2797_s9 = sld [smem:[#allocation14_spill]]  ;;  %v1300_v24 = vld [vmem:[#allocation5] sm:$0xff] }
  0x5f   :  { %2036 = vmatpush3.bf16.msra.mxu1 %v237_v10  ;;  %2037 = vmatprep.mubr.msk.bf16.mxu1 %vm2390_vm0, %v2389_v0  ;;  %v1883_v25 = vld [vmem:[%s2521_s27 + $0x20] sm:$0x7]  ;;  %v485_v29 = vpack.c.bf16 %v484_v23, %v484_v23  ;;  %v1885_v38 = vld [vmem:[%s2521_s27 + $0x24] sm:$0x7]  ;;  %v1891_v40 = vld [vmem:[%s2521_s27 + $0x30] sm:$0x7] }
  0x60   :  { %2047 = vmatprep.subr.bf16.mxu1 %v2389_v0  ;;  %2054 = vmatpush3.bf16.msra.mxu0 %v390_v12  ;;  %v433_v30 = vld [vmem:[%s2426_s25] sm:$0xff]  ;;  %v594_v32 = vsel %vm185_vm1, %v1883_v25, 0  ;;  %v645_v42 = vsel %vm185_vm1, %v1885_v38, 0  ;;  %v798_v44 = vsel %vm185_vm1, %v1891_v40, 0  ;;  %s2798_s13 = sld [smem:[#allocation13_spill]]  ;;  %vm1773_vm3 = vcmask 523264  }
  0x61   :  { %2055 = vmatprep.mubr.msk.bf16.mxu0 %vm2390_vm0, %v2389_v0  ;;  %2065 = vmatprep.subr.bf16.mxu0 %v2389_v0  ;;  %v586_v34 = vld [vmem:[%s2441_s8] sm:$0xff]  ;;  %v434_v35 = vpack.c.bf16 %v433_v30, %v433_v30  ;;  %v1889_v46 = vld [vmem:[%s2521_s27 + $0x2c] sm:$0x7]  ;;  %s2799_s17 = sld [smem:[#allocation16_spill]]  ;;  %v1895_v49 = vld [vmem:[%s2521_s27 + $0x38] sm:$0x7] }
  0x62   :  { %v587_v36 = vpack.c.bf16 %v586_v34, %v586_v34  ;;  %v535_v37 = vld [vmem:[%s2436_s3] sm:$0xff]  ;;  %v747_v50 = vsel %vm185_vm1, %v1889_v46, 0  ;;  %v900_v52 = vsel %vm185_vm1, %v1895_v49, 0  ;;  %s2800_s21 = sld [smem:[#allocation15_spill]]  ;;  %v1893_v54 = vld [vmem:[%s2521_s27 + $0x34] sm:$0x7] }
  0x63   :  { %v688_v39 = vld [vmem:[%s2451_s19] sm:$0xff]  ;;  %v536_v41 = vpack.c.bf16 %v535_v37, %v535_v37  ;;  %s2801_s25 = sld [smem:[#allocation18_spill]]  ;;  %v849_v58 = vsel %vm185_vm1, %v1893_v54, 0  ;;  %v1897_v62 = vld [vmem:[%s2521_s27 + $0x3c] sm:$0x7]  ;;  %s2392_s22 = smov [#allocation8]  }
  0x64   :  { %v689_v43 = vpack.c.bf16 %v688_v39, %v688_v39  ;;  %v637_v45 = vld [vmem:[%s2796_s5] sm:$0xff]  ;;  %s2802_s29 = sld [smem:[#allocation17_spill]]  ;;  %v1903_v2 = vld [vmem:[%s2521_s27 + $0x48] sm:$0x7]  ;;  %v951_v3 = vsel %vm185_vm1, %v1897_v62, 0  ;;  %s1825_s23 = sshll.u32 %s2392_s22, 4  ;;  %s1826_s23 = int_to_ptr.vmem [resolvable:$true] %s1825_s23 }
  0x65   :  { %v790_v47 = vld [vmem:[%s2797_s9] sm:$0xff]  ;;  %v638_v48 = vpack.c.bf16 %v637_v45, %v637_v45  ;;  %s2803_s3 = sld [smem:[#allocation20_spill]]  ;;  %v1104_v5 = vsel %vm185_vm1, %v1903_v2, 0  ;;  %v1907_v10 = vld [vmem:[%s2521_s27 + $0x50] sm:$0x7]  ;;  %vm1817_vm4 = vcmask 64512   ;;  %p2333_p2 = scmp.lt.s32.totalorder %s1826_s23, %s1826_s23 }
  0x66   :  { %2038 = vmatmul.mubr.msk.bf16.vlgmr.msra.gmra.mxu1 %vm181_vm2, %v230_v16  ;;  %2056 = vmatmul.mubr.msk.bf16.vlgmr.msra.gmra.mxu0 %vm181_vm2, %v383_v19  ;;  %v791_v51 = vpack.c.bf16 %v790_v47, %v790_v47  ;;  %v739_v53 = vld [vmem:[%s2798_s13] sm:$0xff]  ;;  %s2804_s8 = sld [smem:[#allocation19_spill]]  ;;  %v1206_v13 = vsel %vm185_vm1, %v1907_v10, 0  ;;  %v1905_v15 = vld [vmem:[%s2521_s27 + $0x4c] sm:$0x7] }
  0x67   :  { %2048 = vmatpush3.bf16.msra.mxu1 %v339_v18  ;;  %2049 = vmatprep.mubr.msk.bf16.mxu1 %vm2390_vm0, %v2389_v0  ;;  %v892_v55 = vld [vmem:[%s2799_s17] sm:$0xff]  ;;  %v740_v56 = vpack.c.bf16 %v739_v53, %v739_v53  ;;  %s2805_s19 = sld [smem:[#allocation22_spill]]  ;;  %v1911_v18 = vld [vmem:[%s2521_s27 + $0x58] sm:$0x7]  ;;  %v1155_v19 = vsel %vm185_vm1, %v1905_v15, 0 }
  0x68   :  { %2059 = vmatprep.subr.bf16.mxu1 %v2389_v0  ;;  %2066 = vmatpush3.bf16.msra.mxu0 %v492_v20  ;;  %v1899_v57 = vld [vmem:[%s2521_s27 + $0x40] sm:$0x7]  ;;  %v893_v59 = vpack.c.bf16 %v892_v55, %v892_v55  ;;  %v1901_v7 = vld [vmem:[%s2521_s27 + $0x44] sm:$0x7]  ;;  %s2806_s6 = sld [smem:[#allocation21_spill]]  ;;  %v1308_v21 = vsel %vm185_vm1, %v1911_v18, 0 }
  0x69   :  { %2067 = vmatprep.mubr.msk.bf16.mxu0 %vm2390_vm0, %v2389_v0  ;;  %2077 = vmatprep.subr.bf16.mxu0 %v2389_v0  ;;  %v1002_v60 = vsel %vm185_vm1, %v1899_v57, 0  ;;  %v841_v61 = vld [vmem:[%s2800_s21] sm:$0xff]  ;;  %v1053_v11 = vsel %vm185_vm1, %v1901_v7, 0  ;;  %v1909_v23 = vld [vmem:[%s2521_s27 + $0x54] sm:$0x7]  ;;  %s2807_s20 = sld [smem:[#allocation24_spill]] }
  0x6a   :  { %v994_v63 = vld [vmem:[%s2801_s25] sm:$0xff]  ;;  %v842_v1 = vpack.c.bf16 %v841_v61, %v841_v61  ;;  %v1257_v26 = vsel %vm185_vm1, %v1909_v23, 0  ;;  %s2809_s4 = sld [smem:[#allocation23_spill]] }
  0x6b   :  { %v995_v4 = vpack.c.bf16 %v994_v63, %v994_v63  ;;  %v943_v6 = vld [vmem:[%s2802_s29] sm:$0xff]  ;;  %s2810_s18 = sld [smem:[#allocation25_spill]] }
  0x6c   :  { %v1096_v8 = vld [vmem:[%s2803_s3] sm:$0xff]  ;;  %v944_v9 = vpack.c.bf16 %v943_v6, %v943_v6 }
  0x6d   :  { %v1097_v12 = vpack.c.bf16 %v1096_v8, %v1096_v8  ;;  %v1045_v14 = vld [vmem:[%s2804_s8] sm:$0xff] }
  0x6e   :  { %2050 = vmatmul.mubr.msk.bf16.vlgmr.msra.gmra.mxu1 %vm181_vm2, %v332_v27  ;;  %2068 = vmatmul.mubr.msk.bf16.vlgmr.msra.gmra.mxu0 %vm181_vm2, %v485_v29  ;;  %v1198_v16 = vld [vmem:[%s2805_s19] sm:$0xff]  ;;  %v1046_v17 = vpack.c.bf16 %v1045_v14, %v1045_v14  ;;  %v1301_v27 = vpack.c.bf16 %v1300_v24, %v1300_v24  ;;  %v1913_v29 = vld [vmem:[%s2521_s27 + $0x5c] sm:$0x7]  ;;  %s2808_s27 = sld [smem:[#allocation26_spill]] }
  0x6f   :  { %2060 = vmatpush3.bf16.msra.mxu1 %v441_v28  ;;  %2061 = vmatprep.mubr.msk.bf16.mxu1 %vm2390_vm0, %v2389_v0  ;;  %v1199_v20 = vpack.c.bf16 %v1198_v16, %v1198_v16  ;;  %v1147_v22 = vld [vmem:[%s2806_s6] sm:$0xff]  ;;  %v2226_v34 = vld [vmem:[%s2807_s20 + $0x74] ss:$8 sps:$4 sm:$0xff]   ;;  %v2230_v39 = vld [vmem:[%s2807_s20 + $0x50] ss:$8 sps:$4 sm:$0xff]  }
  0x70   :  { %2071 = vmatprep.subr.bf16.mxu1 %v2389_v0  ;;  %2078 = vmatpush3.bf16.msra.mxu0 %v594_v32  ;;  %v1148_v25 = vpack.c.bf16 %v1147_v22, %v1147_v22  ;;  %v1249_v28 = vld [vmem:[#allocation2] sm:$0xff]  ;;  %v1351_v32 = vld [vmem:[#allocation7] sm:$0xff] }
  0x71   :  { %2079 = vmatprep.mubr.msk.bf16.mxu0 %vm2390_vm0, %v2389_v0  ;;  %2089 = vmatprep.subr.bf16.mxu0 %v2389_v0  ;;  %v1250_v30 = vpack.c.bf16 %v1249_v28, %v1249_v28  ;;  %v2227_v37 = vld [vmem:[%s2807_s20 + $0x60] ss:$8 sps:$4 sm:$0xff]   ;;  %v2232_v38 = vld [vmem:[%s2807_s20 + $0x54] ss:$8 sps:$4 sm:$0xff]   ;;  %v2235_v40 = vld [vmem:[%s2807_s20 + $0x44] ss:$8 sps:$4 sm:$0xff]  }
  0x72   :  { %v2239_v45 = vld [vmem:[%s2807_s20 + $0x20] ss:$8 sps:$4 sm:$0xff]   ;;  %v2244_v46 = vld [vmem:[%s2807_s20 + $0x14] ss:$8 sps:$4 sm:$0xff]   ;;  %v2242_v47 = vld [vmem:[%s2807_s20 + $0x10] ss:$8 sps:$4 sm:$0xff]  }
  0x73   :  { %v2245_v49 = vld [vmem:[%s2807_s20] ss:$8 sps:$4 sm:$0xff]  }
  0x74   :  { %v2250_v53 = vld [vmem:[%s2808_s27 + $0x70] sm:$0xff]   ;;  %v2252_v55 = vld [vmem:[%s2808_s27 + $0x68] sm:$0xff]   ;;  %v2254_v57 = vld [vmem:[%s2808_s27 + $0x60] sm:$0xff]  }
  0x75   :  { %v2251_v54 = vld [vmem:[%s2808_s27 + $0x30] sm:$0xff]  }
  0x76   :  { %2062 = vmatmul.mubr.msk.bf16.vlgmr.msra.gmra.mxu1 %vm181_vm2, %v434_v35  ;;  %2080 = vmatmul.mubr.msk.bf16.vlgmr.msra.gmra.mxu0 %vm181_vm2, %v587_v36  ;;  %v2224_v35 = vld [vmem:[%s2807_s20 + $0x70] ss:$8 sps:$4 sm:$0xff]   ;;  %v2229_v36 = vld [vmem:[%s2807_s20 + $0x64] ss:$8 sps:$4 sm:$0xff]  }
  0x77   :  { %2072 = vmatpush3.bf16.msra.mxu1 %v543_v31  ;;  %2073 = vmatprep.mubr.msk.bf16.mxu1 %vm2390_vm0, %v2389_v0  ;;  %v1359_v31 = vsel %vm185_vm1, %v1913_v29, 0  ;;  %v2258_v61 = vld [vmem:[%s2808_s27 + $0x50] sm:$0xff]  }
  0x78   :  { %2083 = vmatprep.subr.bf16.mxu1 %v2389_v0  ;;  %2090 = vmatpush3.bf16.msra.mxu0 %v696_v33  ;;  %v1352_v33 = vpack.c.bf16 %v1351_v32, %v1351_v32  ;;  %v2259_v62 = vld [vmem:[%s2808_s27 + $0x10] sm:$0xff]  }
  0x79   :  { %2091 = vmatprep.mubr.msk.bf16.mxu0 %vm2390_vm0, %v2389_v0  ;;  %2101 = vmatprep.subr.bf16.mxu0 %v2389_v0 }
  0x7e   :  { %2074 = vmatmul.mubr.msk.bf16.vlgmr.msra.gmra.mxu1 %vm181_vm2, %v536_v41  ;;  %2092 = vmatmul.mubr.msk.bf16.vlgmr.msra.gmra.mxu0 %vm181_vm2, %v689_v43  ;;  %v2233_v41 = vld [vmem:[%s2807_s20 + $0x40] ss:$8 sps:$4 sm:$0xff]   ;;  %v2236_v43 = vld [vmem:[%s2807_s20 + $0x30] ss:$8 sps:$4 sm:$0xff]  }
  0x7f   :  { %2084 = vmatpush3.bf16.msra.mxu1 %v645_v42  ;;  %2085 = vmatprep.mubr.msk.bf16.mxu1 %vm2390_vm0, %v2389_v0  ;;  %v2238_v42 = vld [vmem:[%s2807_s20 + $0x34] ss:$8 sps:$4 sm:$0xff]  }
  0x80   :  { %2095 = vmatprep.subr.bf16.mxu1 %v2389_v0  ;;  %2102 = vmatpush3.bf16.msra.mxu0 %v798_v44  ;;  %v2241_v44 = vld [vmem:[%s2807_s20 + $0x24] ss:$8 sps:$4 sm:$0xff]  }
  0x81   :  { %2103 = vmatprep.mubr.msk.bf16.mxu0 %vm2390_vm0, %v2389_v0  ;;  %2113 = vmatprep.subr.bf16.mxu0 %v2389_v0 }
  0x86   :  { %2086 = vmatmul.mubr.msk.bf16.vlgmr.msra.gmra.mxu1 %vm181_vm2, %v638_v48  ;;  %2104 = vmatmul.mubr.msk.bf16.vlgmr.msra.gmra.mxu0 %vm181_vm2, %v791_v51  ;;  %v2247_v48 = vld [vmem:[%s2807_s20 + $0x4] ss:$8 sps:$4 sm:$0xff]   ;;  %v2248_v51 = vld [vmem:[%s2808_s27 + $0x78] sm:$0xff]  }
  0x87   :  { %2096 = vmatpush3.bf16.msra.mxu1 %v747_v50  ;;  %2097 = vmatprep.mubr.msk.bf16.mxu1 %vm2390_vm0, %v2389_v0  ;;  %v2391_v50 = vmov 0  }
  0x88   :  { %2107 = vmatprep.subr.bf16.mxu1 %v2389_v0  ;;  %2114 = vmatpush3.bf16.msra.mxu0 %v900_v52  ;;  %v2249_v52 = vld [vmem:[%s2808_s27 + $0x38] sm:$0xff]  }
  0x89   :  { %2115 = vmatprep.mubr.msk.bf16.mxu0 %vm2390_vm0, %v2389_v0  ;;  %2125 = vmatprep.subr.bf16.mxu0 %v2389_v0 }
  0x8e   :  { %2098 = vmatmul.mubr.msk.bf16.vlgmr.msra.gmra.mxu1 %vm181_vm2, %v740_v56  ;;  %2116 = vmatmul.mubr.msk.bf16.vlgmr.msra.gmra.mxu0 %vm181_vm2, %v893_v59  ;;  %v2253_v56 = vld [vmem:[%s2808_s27 + $0x28] sm:$0xff]   ;;  %v2256_v59 = vld [vmem:[%s2808_s27 + $0x58] sm:$0xff]  }
  0x8f   :  { %2108 = vmatpush3.bf16.msra.mxu1 %v849_v58  ;;  %2109 = vmatprep.mubr.msk.bf16.mxu1 %vm2390_vm0, %v2389_v0  ;;  %v2255_v58 = vld [vmem:[%s2808_s27 + $0x20] sm:$0xff]  }
  0x90   :  { %2119 = vmatprep.subr.bf16.mxu1 %v2389_v0  ;;  %2126 = vmatpush3.bf16.msra.mxu0 %v1002_v60  ;;  %v2257_v60 = vld [vmem:[%s2808_s27 + $0x18] sm:$0xff]  }
  0x91   :  { %2127 = vmatprep.mubr.msk.bf16.mxu0 %vm2390_vm0, %v2389_v0  ;;  %2137 = vmatprep.subr.bf16.mxu0 %v2389_v0 }
  0x96   :  { %2110 = vmatmul.mubr.msk.bf16.vlgmr.msra.gmra.mxu1 %vm181_vm2, %v842_v1  ;;  %2128 = vmatmul.mubr.msk.bf16.vlgmr.msra.gmra.mxu0 %vm181_vm2, %v995_v4 }
  0x97   :  { %2120 = vmatpush3.bf16.msra.mxu1 %v951_v3  ;;  %2121 = vmatprep.mubr.msk.bf16.mxu1 %vm2390_vm0, %v2389_v0 }
  0x98   :  { %2131 = vmatprep.subr.bf16.mxu1 %v2389_v0  ;;  %2138 = vmatpush3.bf16.msra.mxu0 %v1104_v5 }
  0x99   :  { %2139 = vmatprep.mubr.msk.bf16.mxu0 %vm2390_vm0, %v2389_v0  ;;  %2149 = vmatprep.subr.bf16.mxu0 %v2389_v0 }
  0x9e   :  { %2122 = vmatmul.mubr.msk.bf16.vlgmr.msra.gmra.mxu1 %vm181_vm2, %v944_v9  ;;  %2140 = vmatmul.mubr.msk.bf16.vlgmr.msra.gmra.mxu0 %vm181_vm2, %v1097_v12 }
  0x9f   :  { %2132 = vmatpush3.bf16.msra.mxu1 %v1053_v11  ;;  %2133 = vmatprep.mubr.msk.bf16.mxu1 %vm2390_vm0, %v2389_v0 }
  0xa0   :  { %2143 = vmatprep.subr.bf16.mxu1 %v2389_v0  ;;  %2150 = vmatpush3.bf16.msra.mxu0 %v1206_v13 }
  0xa1   :  { %2151 = vmatprep.mubr.msk.bf16.mxu0 %vm2390_vm0, %v2389_v0  ;;  %2161 = vmatprep.subr.bf16.mxu0 %v2389_v0 }
  0xa6   :  { %2134 = vmatmul.mubr.msk.bf16.vlgmr.msra.gmra.mxu1 %vm181_vm2, %v1046_v17  ;;  %2152 = vmatmul.mubr.msk.bf16.vlgmr.msra.gmra.mxu0 %vm181_vm2, %v1199_v20 }
  0xa7   :  { %2144 = vmatpush3.bf16.msra.mxu1 %v1155_v19  ;;  %2145 = vmatprep.mubr.msk.bf16.mxu1 %vm2390_vm0, %v2389_v0 }
  0xa8   :  { %2155 = vmatprep.subr.bf16.mxu1 %v2389_v0  ;;  %2162 = vmatpush3.bf16.msra.mxu0 %v1308_v21 }
  0xa9   :  { %2163 = vmatprep.mubr.msk.bf16.mxu0 %vm2390_vm0, %v2389_v0  ;;  %1512 = vmatprep.subr.bf16.mxu0 %v2226_v34 }
  0xae   :  { %2146 = vmatmul.mubr.msk.bf16.vlgmr.msra.gmra.mxu1 %vm181_vm2, %v1148_v25  ;;  %2164 = vmatmul.mubr.msk.bf16.vlgmr.msra.gmra.mxu0 %vm181_vm2, %v1301_v27  ;;  %v1867_v25 = vld [vmem:[%s2809_s4] ss:$0 sm:$0xff] }
  0xaf   :  { %2156 = vmatpush3.bf16.msra.mxu1 %v1257_v26  ;;  %2157 = vmatprep.mubr.msk.bf16.mxu1 %vm2390_vm0, %v2389_v0 }
  0xb0   :  { %2167 = vmatprep.subr.bf16.mxu1 %v2389_v0  ;;  %1513 = vmatpush1.bf16.msra.mxu0 %v2224_v35 }
  0xb1   :  { %1514 = vmatprep.subr.bf16.mxu0 %v2229_v36  ;;  %1544 = vmatprep.mubr.bf16.mxu0 %v2391_v50 }
  0xb4   :  { %1515 = vmatpush1.bf16.msra.mxu0 %v2227_v37 }
  0xb5   :  { %1516 = vmatprep.subr.bf16.mxu0 %v2232_v38 }
  0xb6   :  { %2158 = vmatmul.mubr.msk.bf16.vlgmr.msra.gmra.mxu1 %vm181_vm2, %v1250_v30 }
  0xb7   :  { %2168 = vmatpush3.bf16.msra.mxu1 %v1359_v31  ;;  %2169 = vmatprep.mubr.msk.bf16.mxu1 %vm2390_vm0, %v2389_v0 }
  0xb8   :  { %1517 = vmatpush1.bf16.msra.mxu0 %v2230_v39  ;;  %2002 = vmatprep.subr.bf16.mxu1 %v2248_v51 }
  0xb9   :  { %1518 = vmatprep.subr.bf16.mxu0 %v2235_v40 }
  0xbc   :  { %1519 = vmatpush1.bf16.msra.mxu0 %v2233_v41 }
  0xbd   :  { %1520 = vmatprep.subr.bf16.mxu0 %v2238_v42 }
  0xbe   :  { %2170 = vmatmul.mubr.msk.bf16.vlgmr.msra.gmra.mxu1 %vm181_vm2, %v1352_v33 }
  0xbf   :  { %2003 = vmatpush3.bf16.msra.mxu1 %v2249_v52 }
  0xc0   :  { %1521 = vmatpush1.bf16.msra.mxu0 %v2236_v43  ;;  %2004 = vmatprep.subr.bf16.mxu1 %v2250_v53 }
  0xc1   :  { %1522 = vmatprep.subr.bf16.mxu0 %v2241_v44 }
  0xc3   :  { %2005 = vmatpush3.bf16.msra.mxu1 %v2251_v54 }
  0xc4   :  { %1523 = vmatpush1.bf16.msra.mxu0 %v2239_v45  ;;  %2006 = vmatprep.subr.bf16.mxu1 %v2252_v55 }
  0xc5   :  { %1524 = vmatprep.subr.bf16.mxu0 %v2244_v46 }
  0xc7   :  { %2007 = vmatpush3.bf16.msra.mxu1 %v2253_v56 }
  0xc8   :  { %1525 = vmatpush1.bf16.msra.mxu0 %v2242_v47  ;;  %2008 = vmatprep.subr.bf16.mxu1 %v2254_v57 }
  0xc9   :  { %1526 = vmatprep.subr.bf16.mxu0 %v2247_v48 }
  0xcb   :  { %2009 = vmatpush3.bf16.msra.mxu1 %v2255_v58 }
  0xcc   :  { %1527 = vmatpush1.bf16.msra.mxu0 %v2245_v49  ;;  %2010 = vmatprep.subr.bf16.mxu1 %v2256_v59 }
  0xcd   :  { %2173 = vmatprep.subr.bf16.mxu0 %v2389_v0 }
  0xcf   :  { %2011 = vmatpush3.bf16.msra.mxu1 %v2257_v60 }
  0xd0   :  { %2012 = vmatprep.subr.bf16.mxu1 %v2258_v61 }
  0xd3   :  { %2013 = vmatpush3.bf16.msra.mxu1 %v2259_v62 }
 0x11e   :  { %v223_v63 = vpop.f32.mrf.mxu1  ;;  %v324_v2 = vpop.f32.mrf.mxu0 }
 0x11f   :  { %v224_v30 = vadd.f32 %v1867_v25, %v223_v63 }
 0x120   :  { %v2033_v1 = vpop.f32.mrf.mxu1  ;;  %v2045_v4 = vpop.f32.mrf.mxu0 }
 0x122   :  { %v226_v3 = vpop.f32.mrf.mxu1  ;;  %v327_v6 = vpop.f32.mrf.mxu0 }
 0x124   :  { %v2034_v5 = vpop.f32.mrf.mxu1  ;;  %v2046_v8 = vpop.f32.mrf.mxu0 }
 0x126   :  { %v273_v7 = vpop.f32.mrf.mxu1  ;;  %v426_v10 = vpop.f32.mrf.mxu0 }
 0x127   :  { %v279_v33 = vadd.f32 %v273_v7, %v224_v30 }
 0x128   :  { %v2039_v9 = vpop.f32.mrf.mxu1  ;;  %v2057_v12 = vpop.f32.mrf.mxu0 }
 0x129   :  { %v330_v38 = vadd.f32 %v324_v2, %v279_v33 }
 0x12a   :  { %v276_v11 = vpop.f32.mrf.mxu1  ;;  %v429_v14 = vpop.f32.mrf.mxu0 }
 0x12c   :  { %v2040_v13 = vpop.f32.mrf.mxu1  ;;  %v2058_v16 = vpop.f32.mrf.mxu0 }
 0x12e   :  { %v375_v15 = vpop.f32.mrf.mxu1  ;;  %v528_v18 = vpop.f32.mrf.mxu0 }
 0x12f   :  { %v381_v41 = vadd.f32 %v375_v15, %v330_v38 }
 0x130   :  { %v2051_v17 = vpop.f32.mrf.mxu1  ;;  %v2069_v20 = vpop.f32.mrf.mxu0 }
 0x131   :  { %v432_v46 = vadd.f32 %v426_v10, %v381_v41 }
 0x132   :  { %v378_v19 = vpop.f32.mrf.mxu1  ;;  %v531_v22 = vpop.f32.mrf.mxu0 }
 0x134   :  { %v2052_v21 = vpop.f32.mrf.mxu1  ;;  %v2070_v24 = vpop.f32.mrf.mxu0 }
 0x136   :  { %v477_v23 = vpop.f32.mrf.mxu1  ;;  %v630_v27 = vpop.f32.mrf.mxu0 }
 0x137   :  { %v483_v49 = vadd.f32 %v477_v23, %v432_v46 }
 0x138   :  { %v2063_v26 = vpop.f32.mrf.mxu1  ;;  %v2081_v29 = vpop.f32.mrf.mxu0 }
 0x139   :  { %v534_v54 = vadd.f32 %v528_v18, %v483_v49 }
 0x13a   :  { %v480_v28 = vpop.f32.mrf.mxu1  ;;  %v633_v32 = vpop.f32.mrf.mxu0 }
 0x13c   :  { %v2064_v31 = vpop.f32.mrf.mxu1  ;;  %v2082_v35 = vpop.f32.mrf.mxu0 }
 0x13e   :  { %v579_v34 = vpop.f32.mrf.mxu1  ;;  %v732_v37 = vpop.f32.mrf.mxu0 }
 0x13f   :  { %v585_v57 = vadd.f32 %v579_v34, %v534_v54 }
 0x140   :  { %v2075_v36 = vpop.f32.mrf.mxu1  ;;  %v2093_v40 = vpop.f32.mrf.mxu0 }
 0x141   :  { %v636_v62 = vadd.f32 %v630_v27, %v585_v57 }
 0x142   :  { %v582_v39 = vpop.f32.mrf.mxu1  ;;  %v735_v43 = vpop.f32.mrf.mxu0 }
 0x144   :  { %v2076_v42 = vpop.f32.mrf.mxu1  ;;  %v2094_v45 = vpop.f32.mrf.mxu0 }
 0x146   :  { %v681_v44 = vpop.f32.mrf.mxu1  ;;  %v834_v48 = vpop.f32.mrf.mxu0 }
 0x147   :  { %v687_v2 = vadd.f32 %v681_v44, %v636_v62  ;;  %v2262_v62 = vld [vmem:[%s2808_s27 + $0x40] sm:$0xff]  }
 0x148   :  { %v2087_v47 = vpop.f32.mrf.mxu1  ;;  %v2105_v51 = vpop.f32.mrf.mxu0 }
 0x149   :  { %v738_v7 = vadd.f32 %v732_v37, %v687_v2  ;;  %v1422_v2 = vlaneseq }
 0x14a   :  { %v684_v50 = vpop.f32.mrf.mxu1  ;;  %v837_v53 = vpop.f32.mrf.mxu0 }
 0x14c   :  { %v2088_v52 = vpop.f32.mrf.mxu1  ;;  %v2106_v56 = vpop.f32.mrf.mxu0 }
 0x14e   :  { %v783_v55 = vpop.f32.mrf.mxu1  ;;  %v936_v59 = vpop.f32.mrf.mxu0 }
 0x14f   :  { %v789_v10 = vadd.f32 %v783_v55, %v738_v7 }
 0x150   :  { %v2099_v58 = vpop.f32.mrf.mxu1  ;;  %v2117_v61 = vpop.f32.mrf.mxu0 }
 0x151   :  { %v840_v15 = vadd.f32 %v834_v48, %v789_v10  ;;  %v2261_v61 = vld [vmem:[%s2808_s27 + $0x8] sm:$0xff]  }
 0x152   :  { %v786_v60 = vpop.f32.mrf.mxu1  ;;  %v939_v1 = vpop.f32.mrf.mxu0 }
 0x153   :  { %v2260_v60 = vld [vmem:[%s2808_s27 + $0x48] sm:$0xff]   ;;  %v2264_v1 = vld [vmem:[%s2551_s24 + $0x18] sm:$0xff]  }
 0x154   :  { %v2100_v63 = vpop.f32.mrf.mxu1  ;;  %v2118_v4 = vpop.f32.mrf.mxu0  ;;  %2014 = vmatprep.subr.bf16.mxu1 %v2260_v60 }
 0x155   :  { %2015 = vmatpush3.bf16.msra.mxu1 %v2261_v61  ;;  %v2263_v63 = vld [vmem:[%s2808_s27] sm:$0xff]  }
 0x156   :  { %v885_v3 = vpop.f32.mrf.mxu1  ;;  %v1038_v6 = vpop.f32.mrf.mxu0  ;;  %2016 = vmatprep.subr.bf16.mxu1 %v2262_v62 }
 0x157   :  { %v891_v18 = vadd.f32 %v885_v3, %v840_v15  ;;  %v1423_v3 = vshrl.u32 %v1422_v2, 7 }
 0x158   :  { %v2111_v5 = vpop.f32.mrf.mxu1  ;;  %v2129_v9 = vpop.f32.mrf.mxu0 }
 0x159   :  { %v942_v23 = vadd.f32 %v936_v59, %v891_v18  ;;  %2017 = vmatpush3.bf16.msra.mxu1 %v2263_v63  ;;  %v1424_v4 = vsub.s32 0, %v1423_v3  ;;  %v1420_v5 = vld [vmem:[%s2810_s18] sm:$0x3] }
 0x15a   :  { %v888_v8 = vpop.f32.mrf.mxu1  ;;  %v1041_v12 = vpop.f32.mrf.mxu0 }
 0x15b   :  { %v1425_v7 = vrot.slane %v1420_v5, %v1424_v4 }
 0x15c   :  { %v2112_v11 = vpop.f32.mrf.mxu1  ;;  %v2130_v14 = vpop.f32.mrf.mxu0 }
 0x15e   :  { %v987_v13 = vpop.f32.mrf.mxu1  ;;  %v1140_v17 = vpop.f32.mrf.mxu0 }
 0x15f   :  { %v993_v26 = vadd.f32 %v987_v13, %v942_v23  ;;  %v1931_v23 = vld [vmem:[%s2546_s12] ss:$0 sm:$0xff] }
 0x160   :  { %v2123_v16 = vpop.f32.mrf.mxu1  ;;  %v2141_v20 = vpop.f32.mrf.mxu0 }
 0x161   :  { %v1044_v31 = vadd.f32 %v1038_v6, %v993_v26  ;;  %v1428_v6 = vsub.s32 1, %v1423_v3  ;;  %v2266_v20 = vld [vmem:[%s2551_s24 + $0x8] sm:$0xff]  }
 0x162   :  { %v990_v19 = vpop.f32.mrf.mxu1  ;;  %v1143_v22 = vpop.f32.mrf.mxu0 }
 0x163   :  { %v1429_v8 = vrot.slane %v1420_v5, %v1428_v6  ;;  %v2265_v19 = vld [vmem:[%s2551_s24 + $0x10] sm:$0xff]  }
 0x164   :  { %v2124_v21 = vpop.f32.mrf.mxu1  ;;  %v2142_v25 = vpop.f32.mrf.mxu0 }
 0x165   :  { %v2267_v21 = vld [vmem:[%s2551_s24] sm:$0xff]   ;;  %s2328_s24 = scalar_lea.vmem %s1826_s23, 128 }
 0x166   :  { %v1089_v24 = vpop.f32.mrf.mxu1  ;;  %v1242_v28 = vpop.f32.mrf.mxu0  ;;  %p2329_p1 = scmp.ne.s32.totalorder %s1826_s23, %s2328_s24  ;;  %p2334_p3 = scmp.lt.s32.totalorder %s2328_s24, %s2328_s24 }
 0x167   :  { %v1095_v34 = vadd.f32 %v1089_v24, %v1044_v31  ;;  %v1948_v31 = vld [vmem:[%s2556_s30] ss:$0 sm:$0xff] }
 0x168   :  { %v2135_v27 = vpop.f32.mrf.mxu1  ;;  %v2153_v30 = vpop.f32.mrf.mxu0  ;;  %p2335_p4 = por %p2334_p3, %p2333_p2 }
 0x169   :  { %v1146_v39 = vadd.f32 %v1140_v17, %v1095_v34 }
 0x16a   :  { %v1092_v29 = vpop.f32.mrf.mxu1  ;;  %v1245_v33 = vpop.f32.mrf.mxu0  ;;  %p2336_p5 = pnand %p2335_p4, %p2329_p1 }
 0x16c   :  { %v2136_v32 = vpop.f32.mrf.mxu1  ;;  %v2154_v36 = vpop.f32.mrf.mxu0 }
 0x16e   :  { %v1191_v35 = vpop.f32.mrf.mxu1  ;;  %v1344_v38 = vpop.f32.mrf.mxu0 }
 0x16f   :  { %v1197_v42 = vadd.f32 %v1191_v35, %v1146_v39 }
 0x170   :  { %v2147_v37 = vpop.f32.mrf.mxu1  ;;  %v2165_v41 = vpop.f32.mrf.mxu0 }
 0x171   :  { %v1248_v47 = vadd.f32 %v1242_v28, %v1197_v42 }
 0x172   :  { %v1194_v40 = vpop.f32.mrf.mxu1  ;;  %v1347_v44 = vpop.f32.mrf.mxu0 }
 0x174   :  { %v2148_v43 = vpop.f32.mrf.mxu1  ;;  %v2166_v46 = vpop.f32.mrf.mxu0 }
 0x176   :  { %v1293_v45 = vpop.f32.mrf.mxu1 }
 0x177   :  { %v1299_v49 = vadd.f32 %v1293_v45, %v1248_v47 }
 0x178   :  { %v2159_v48 = vpop.f32.mrf.mxu1 }
 0x179   :  { %v1350_v52 = vadd.f32 %v1344_v38, %v1299_v49 }
 0x17a   :  { %v1296_v50 = vpop.f32.mrf.mxu1 }
 0x17c   :  { %v2160_v51 = vpop.f32.mrf.mxu1 }
 0x17e   :  { %v1395_v53 = vpop.f32.mrf.mxu1 }
 0x17f   :  { %v1401_v54 = vadd.f32 %v1395_v53, %v1350_v52 }
 0x180   :  { %v2171_v55 = vpop.f32.mrf.mxu1 }
 0x181   :  { %v1402_v56 = vmax.f32 %v1401_v54, 0.0 }
 0x182   :  { %v1398_v57 = vpop.f32.mrf.mxu1 }
 0x183   :  { %v1403_v58 = vpack.c.bf16 %v1402_v56, %v1402_v56 }
 0x184   :  { %v2172_v59 = vpop.f32.mrf.mxu1 }
 0x185   :  { %1545 = vmatmul.mubr.bf16.vlgmr.msra.gmra.mxu0 %v1403_v58 }
 0x186   :  { %2181 = vmatprep.mubr.msk.bf16.mxu0 %vm2390_vm0, %v2389_v0  ;;  %2174 = vmatpush3.bf16.msra.mxu0 %v2264_v1 }
 0x187   :  { %2175 = vmatprep.subr.bf16.mxu0 %v2389_v0 }
 0x18a   :  { %2176 = vmatpush3.bf16.msra.mxu0 %v2265_v19 }
 0x18b   :  { %2177 = vmatprep.subr.bf16.mxu0 %v2389_v0 }
 0x18e   :  { %2178 = vmatpush3.bf16.msra.mxu0 %v2266_v20 }
 0x18f   :  { %2179 = vmatprep.subr.bf16.mxu0 %v2389_v0 }
 0x192   :  { %2180 = vmatpush3.bf16.msra.mxu0 %v2267_v21 }
 0x245   :  { %v1546_v9 = vpop.f32.mrf.mxu0 }
 0x246   :  { %v1547_v10 = vadd.f32 %v1546_v9, %v1425_v7 }
 0x247   :  { %v1548_v11 = vpop.f32.mrf.mxu0 }
 0x248   :  { %v1549_v12 = vadd.f32 %v1548_v11, %v1429_v8  ;;  %v1553_v13 = vmax.f32 %v1547_v10, 0.0 }
 0x249   :  { %v1550_v14 = vpop.f32.mrf.mxu0 }
 0x24a   :  { %v1554_v15 = vmax.f32 %v1549_v12, 0.0  ;;  %v1555_v18 = vpack.c.bf16 %v1553_v13, %v1553_v13 }
 0x24b   :  { %v1551_v16 = vpop.f32.mrf.mxu0 }
 0x24c   :  { %v1556_v17 = vpack.c.bf16 %v1554_v15, %v1554_v15 }
 0x24e   :  { %1724 = vmatprep.mubr.bf16.mxu1 %v1556_v17 }
 0x24f   :  { %1725 = vmatmul.mubr.bf16.vlgmr.msra.gmra.mxu1 %v1555_v18 }
 0x30f   :  { %v2018_v22 = vpop.f32.mrf.mxu1 }
 0x311   :  { %v2019_v24 = vpop.f32.mrf.mxu1 }
 0x312   :  { %v2020_v25 = vadd.f32 %v2019_v24, %v2018_v22 }
 0x313   :  { %v2021_v26 = vpop.f32.mrf.mxu1 }
 0x314   :  { %v1727_v27 = vadd.f32 %v2020_v25, %v1931_v23 }
 0x315   :  { %v2022_v28 = vpop.f32.mrf.mxu1 }
 0x316   :  { %v1732_v29 = vmax.f32 %v1727_v27, 0.0 }
 0x318   :  { %v1733_v30 = vpack.c.bf16 %v1732_v29, %v1732_v29 }
 0x31a   :  { %2182 = vmatmul.mubr.msk.bf16.vlgmr.msra.gmra.mxu0 %vm1773_vm3, %v1733_v30 }
 0x3da   :  { %v1811_v32 = vpop.f32.mrf.mxu0 }
 0x3db   :  { %v1812_v33 = vadd.f32 %v1948_v31, %v1811_v32 }
 0x3dc   :  { %v2183_v0 = vpop.f32.mrf.mxu0 }
 0x3dd   :  { %1818 = vst.msk [vmem:[#allocation8] sm:$0xff] %vm1817_vm4, %v1812_v33 }
 0x3de   :  { %v1814_v34 = vpop.f32.mrf.mxu0 }
 0x3df   :  { %2339 = shalt.err (!%p2336_p5)
}
 0x3e0   :  { %1828 = dma.vmem_to_hbm [thread:$0]  %s1826_s23, 128, %s2561_s14, [#allocation4]   ;;  %v2184_v35 = vpop.f32.mrf.mxu0 }
 0x3e1   :  { %2352 = dma.done.wait [#allocation4], 128  }
 0x3e2   :  { %2353 = vsyncadd [#allocation4], 4294967168 }
 0x3e3   :  { %1832 = vsyncpa [#allocation3], 1 }
 0x3e4   :  { %1833 = vsyncpa [#allocation6], 1 }
 0x3e5   :  { %1834 = vsyncpa [#allocation4], 1 }

</bundles_post_ra>
